<compile_context>
chip_gen: v6e
topology: v6e:2x2x1
jax: 0.10.0
libtpu: 0.0.40
codegen_flags: <defaults>
</compile_context>

<pallas_src>
import functools

import jax
import jax.numpy as jnp
from jax.experimental import pallas as pl
from jax.experimental.pallas import tpu as pltpu


LANE = 128                     # TPU lane width; channel padding target
STRIDES = (1, 2, 2, 2)         # ResNet18 per-layer first-block strides (static)

Q_SCALE = 0.05                 # fixed "calibrated" quantization parameters
Q_ZERO_POINT = 128.0

TK_SINGLE_MAX = 2048           # whole-K-in-one-step threshold (VMEM-safe)
VMEM_LIMIT = 32 * 1024 * 1024  # scoped VMEM request (within every generation)


def _round_up(x, m):
    return (x + m - 1) // m * m


def _choose_m_tile(m):
    """Return (tm, MP): tm is a multiple of 16 (bf16 sublane packing), <= 512.

    Prefers >= 2 M tiles (keeps both v7x TensorCores busy) and MP == M
    (no pad copy) whenever possible.
    """
    mp16 = _round_up(m, 16)
    if mp16 <= 16:
        return mp16, mp16
    if mp16 <= 1024 and mp16 % 32 == 0:
        return mp16 // 2, mp16          # two parallel tiles, no extra pad
    if mp16 <= 512:
        return mp16, mp16
    for tm in range(512, 63, -16):      # big M: prefer a divisor of MP
        if mp16 % tm == 0:
            return tm, mp16
    return 512, _round_up(m, 512)


def _choose_k_tile(kp):
    if kp <= TK_SINGLE_MAX:
        return kp                        # whole reduction in one step
    for tk in (2048, 1536, 1152, 1024, 768, 512, 384, 256, 128):
        if kp % tk == 0:
            return tk
    return 128                           # unreachable: kp is a multiple of 128


# ----------------------------------------------------------------------------
# Pallas kernels
# ----------------------------------------------------------------------------
def _mm_kernel_1k(*refs, relu, has_sc):
    # Single K step: o = act((A @ B) * scale + bias [+ shortcut]).
    if has_sc:
        a_ref, b_ref, s_ref, c_ref, sc_ref, o_ref = refs
    else:
        a_ref, b_ref, s_ref, c_ref, o_ref = refs
        sc_ref = None
    y = jnp.dot(a_ref[...], b_ref[...], preferred_element_type=jnp.float32)
    y = y * s_ref[...] + c_ref[...]
    if has_sc:
        y = y + sc_ref[...].astype(jnp.float32)
    if relu:
        y = jnp.maximum(y, 0.0)
    o_ref[...] = y.astype(o_ref.dtype)


def _mm_kernel_multik(*refs, relu, has_sc):
    # K-tiled fallback (KP > TK_SINGLE_MAX): f32 VMEM accumulator.
    if has_sc:
        a_ref, b_ref, s_ref, c_ref, sc_ref, o_ref, acc_ref = refs
    else:
        a_ref, b_ref, s_ref, c_ref, o_ref, acc_ref = refs
        sc_ref = None
    k = pl.program_id(2)

    @pl.when(k == 0)
    def _init():
        acc_ref[...] = jnp.zeros_like(acc_ref)

    acc_ref[...] += jnp.dot(a_ref[...], b_ref[...],
                            preferred_element_type=jnp.float32)

    @pl.when(k == pl.num_programs(2) - 1)
    def _finalize():
        y = acc_ref[...] * s_ref[...] + c_ref[...]
        if has_sc:
            y = y + sc_ref[...].astype(jnp.float32)
        if relu:
            y = jnp.maximum(y, 0.0)
        o_ref[...] = y.astype(o_ref.dtype)


def matmul_fused(a, b, scale, bias, *, relu, shortcut=None,
                 out_dtype=jnp.bfloat16):
    """a:(M,K); b:(KP,NP) bf16 pre-padded (K<=KP); scale/bias:(1,NP) f32.

    Returns (M, NP) out_dtype.  shortcut (optional): (M, NP), added pre-ReLU.
    """
    M, K = a.shape
    KP, NP = b.shape
    assert K <= KP and KP % LANE == 0 and NP % LANE == 0

    tm, MP = _choose_m_tile(M)
    tn = 256 if NP % 256 == 0 else LANE   # 256-wide N feeds v6e/v7x MXUs
    tk = _choose_k_tile(KP)
    nk = KP // tk

    a = a.astype(jnp.bfloat16)
    if MP != M or KP != K:
        a = jnp.pad(a, ((0, MP - M), (0, KP - K)))

    inputs = [a, b, scale, bias]
    has_sc = shortcut is not None
    if has_sc:
        assert shortcut.shape == (M, NP)
        sc = shortcut.astype(jnp.bfloat16)
        if MP != M:
            sc = jnp.pad(sc, ((0, MP - M), (0, 0)))
        inputs.append(sc)

    if nk == 1:
        grid = (MP // tm, NP // tn)
        in_specs = [
            pl.BlockSpec((tm, KP), lambda i, j: (i, 0)),
            pl.BlockSpec((KP, tn), lambda i, j: (0, j)),
            pl.BlockSpec((1, tn), lambda i, j: (0, j)),
            pl.BlockSpec((1, tn), lambda i, j: (0, j)),
        ]
        if has_sc:
            in_specs.append(pl.BlockSpec((tm, tn), lambda i, j: (i, j)))
        out_specs = pl.BlockSpec((tm, tn), lambda i, j: (i, j))
        kern = functools.partial(_mm_kernel_1k, relu=relu, has_sc=has_sc)
        scratch = []
        dims = ("parallel", "parallel")
    else:
        grid = (MP // tm, NP // tn, nk)
        in_specs = [
            pl.BlockSpec((tm, tk), lambda i, j, k: (i, k)),
            pl.BlockSpec((tk, tn), lambda i, j, k: (k, j)),
            pl.BlockSpec((1, tn), lambda i, j, k: (0, j)),
            pl.BlockSpec((1, tn), lambda i, j, k: (0, j)),
        ]
        if has_sc:
            in_specs.append(pl.BlockSpec((tm, tn), lambda i, j, k: (i, j)))
        out_specs = pl.BlockSpec((tm, tn), lambda i, j, k: (i, j))
        kern = functools.partial(_mm_kernel_multik, relu=relu, has_sc=has_sc)
        scratch = [pltpu.VMEM((tm, tn), jnp.float32)]
        dims = ("parallel", "parallel", "arbitrary")

    out = pl.pallas_call(
        kern,
        out_shape=jax.ShapeDtypeStruct((MP, NP), out_dtype),
        grid=grid,
        in_specs=in_specs,
        out_specs=out_specs,
        scratch_shapes=scratch,
        compiler_params=pltpu.CompilerParams(
            dimension_semantics=dims, vmem_limit_bytes=VMEM_LIMIT),
    )(*inputs)
    return out[:M]


def _fq_kernel(x_ref, o_ref):
    # quint8 affine quantize + dequantize (fake quant).
    q = jnp.clip(jnp.round(x_ref[...] * (1.0 / Q_SCALE)) + Q_ZERO_POINT,
                 0.0, 255.0)
    o_ref[...] = (q - Q_ZERO_POINT) * Q_SCALE


def fake_quant(x):
    """QuantStub applied once to the raw input (hoisted out of the stem
    matmul's inner loop, per perf review)."""
    shape = x.shape
    flat = x.astype(jnp.float32).reshape(-1)
    n = flat.shape[0]
    rows = _round_up((n + LANE - 1) // LANE, 8)
    flat = jnp.pad(flat, (0, rows * LANE - n)).reshape(rows, LANE)
    tr = min(rows, 512)
    while rows % tr:
        tr -= 8
    out = pl.pallas_call(
        _fq_kernel,
        out_shape=jax.ShapeDtypeStruct((rows, LANE), jnp.float32),
        grid=(rows // tr,),
        in_specs=[pl.BlockSpec((tr, LANE), lambda i: (i, 0))],
        out_specs=pl.BlockSpec((tr, LANE), lambda i: (i, 0)),
        compiler_params=pltpu.CompilerParams(
            dimension_semantics=("parallel",)),
    )(flat)
    return out.reshape(-1)[:n].reshape(shape)


def _max9_kernel(*refs):
    # 9 lane-dense tap tiles -> elementwise max.
    o_ref = refs[-1]
    m = refs[0][...]
    for r in refs[1:-1]:
        m = jnp.maximum(m, r[...])
    o_ref[...] = m


def maxpool_3x3_s2_p1(x):
    # x: (N, H, W, 128) NHWC bf16, channels already lane-padded (pads are 0).
    # TODO(synk): taps are still materialized by XLA; a windowed in-kernel
    #   pool would read each input element ~once instead of ~9x.
    N, H, W, C = x.shape
    Ho = (H + 2 - 3) // 2 + 1
    Wo = (W + 2 - 3) // 2 + 1
    xp = jnp.pad(x, ((0, 0), (1, 1), (1, 1), (0, 0)),
                 constant_values=-jnp.inf)
    M = N * Ho * Wo
    tm, MP = _choose_m_tile(M)
    taps = []
    for dy in range(3):
        for dx in range(3):
            t = xp[:, dy:dy + (Ho - 1) * 2 + 1:2,
                      dx:dx + (Wo - 1) * 2 + 1:2, :].reshape(M, C)
            if MP != M:
                t = jnp.pad(t, ((0, MP - M), (0, 0)))
            taps.append(t)
    out = pl.pallas_call(
        _max9_kernel,
        out_shape=jax.ShapeDtypeStruct((MP, C), x.dtype),
        grid=(MP // tm,),
        in_specs=[pl.BlockSpec((tm, C), lambda i: (i, 0)) for _ in range(9)],
        out_specs=pl.BlockSpec((tm, C), lambda i: (i, 0)),
        compiler_params=pltpu.CompilerParams(
            dimension_semantics=("parallel",)),
    )(*taps)
    return out[:M].reshape(N, Ho, Wo, C)


# ----------------------------------------------------------------------------
# Glue: im2col (static strides), conv+BN, blocks
# ----------------------------------------------------------------------------
def _im2col(x, kh, kw, stride, pad):
    # x: (N, H, W, C) NHWC -> (N*Ho*Wo, kh*kw*C); stride/pad are Python ints.
    # TODO(synk): patches are materialized in HBM by XLA (kh*kw read
    #   amplification); move this gather inside the matmul kernel next.
    N, H, W, C = x.shape
    Ho = (H + 2 * pad - kh) // stride + 1
    Wo = (W + 2 * pad - kw) // stride + 1
    xp = jnp.pad(x, ((0, 0), (pad, pad), (pad, pad), (0, 0))) if pad else x
    cols = []
    for dy in range(kh):
        for dx in range(kw):
            cols.append(
                xp[:, dy:dy + (Ho - 1) * stride + 1:stride,
                      dx:dx + (Wo - 1) * stride + 1:stride, :])
    patches = jnp.concatenate(cols, axis=-1)  # (N, Ho, Wo, kh*kw*C)
    return patches.reshape(N * Ho * Wo, kh * kw * C), Ho, Wo


def conv_bn(x, wmat, scale, bias, *, kh, kw, stride, pad, relu,
            shortcut=None):
    # wmat: pre-transposed / pre-padded bf16 (KP, NP); BN folded into s/b.
    patches, Ho, Wo = _im2col(x, kh, kw, stride, pad)
    out = matmul_fused(patches, wmat, scale, bias, relu=relu,
                       shortcut=shortcut, out_dtype=jnp.bfloat16)
    return out.reshape(x.shape[0], Ho, Wo, wmat.shape[1])


def basic_block(x, prm, stride):
    out = conv_bn(x, prm["conv1_w"], prm["conv1_s"], prm["conv1_b"],
                  kh=3, kw=3, stride=stride, pad=1, relu=True)
    if "down_w" in prm:
        sc = conv_bn(x, prm["down_w"], prm["down_s"], prm["down_b"],
                     kh=1, kw=1, stride=stride, pad=0, relu=False)
    else:
        sc = x
    sc2d = sc.reshape(-1, sc.shape[-1])
    # conv2 with the residual add + ReLU fused into the matmul epilogue.
    out = conv_bn(out, prm["conv2_w"], prm["conv2_s"], prm["conv2_b"],
                  kh=3, kw=3, stride=1, pad=1, relu=True, shortcut=sc2d)
    return out


# ----------------------------------------------------------------------------
# Parameters: deterministic construction (torch layout) + one-time folding
# into padded bf16 (K, N) matmul operands.
# ----------------------------------------------------------------------------
def _make_conv_bn(key, cin, cout, k):
    k1, k2, k3, k4, k5 = jax.random.split(key, 5)
    w = 0.1 * jax.random.normal(k1, (cout, cin, k, k), jnp.float32)
    gamma = 1.0 + 0.1 * jax.random.normal(k2, (cout,), jnp.float32)
    beta = 0.1 * jax.random.normal(k3, (cout,), jnp.float32)
    mean = 0.1 * jax.random.normal(k4, (cout,), jnp.float32)
    var = 1.0 + 0.1 * jnp.abs(jax.random.normal(k5, (cout,), jnp.float32))
    scale = gamma / jnp.sqrt(var + 1e-5)
    bias = beta - mean * scale
    return w, scale, bias


def make_params(key, in_ch=3, width=8, num_classes=10):
    widths = [width, 2 * width, 4 * width, 8 * width]
    keys = jax.random.split(key, 64)
    ki = iter(range(64))
    raw = {"stem": _make_conv_bn(keys[next(ki)], in_ch, widths[0], 7)}
    cin = widths[0]
    layers = []
    for li, cout in enumerate(widths):
        blocks = []
        for bi in range(2):
            stride = STRIDES[li] if bi == 0 else 1
            blk = {
                "conv1": _make_conv_bn(keys[next(ki)], cin, cout, 3),
                "conv2": _make_conv_bn(keys[next(ki)], cout, cout, 3),
            }
            if stride != 1 or cin != cout:
                blk["down"] = _make_conv_bn(keys[next(ki)], cin, cout, 1)
            blocks.append(blk)
            cin = cout
        layers.append(blocks)
    raw["layers"] = layers
    raw["fc"] = (
        0.1 * jax.random.normal(keys[next(ki)], (num_classes, widths[-1]),
                                jnp.float32),
        0.01 * jax.random.normal(keys[next(ki)], (num_classes,), jnp.float32),
    )
    return raw


def _prep_conv(w, scale, bias, *, cin_pad):
    # torch layout (Cout, Cin, kh, kw) -> padded bf16 (KP, NP) matmul weight.
    cout, cin, kh, kw = w.shape
    cin_eff = cin if cin_pad is None else max(cin, cin_pad)
    if cin_eff > cin:
        w = jnp.pad(w, ((0, 0), (0, cin_eff - cin), (0, 0), (0, 0)))
    wmat = jnp.transpose(w, (2, 3, 1, 0)).reshape(kh * kw * cin_eff, cout)
    kp = _round_up(wmat.shape[0], LANE)
    np_ = _round_up(cout, LANE)
    wmat = jnp.pad(wmat, ((0, kp - wmat.shape[0]), (0, np_ - cout)))
    s = jnp.pad(scale.reshape(1, -1), ((0, 0), (0, np_ - cout)))
    b = jnp.pad(bias.reshape(1, -1), ((0, 0), (0, np_ - cout)))
    return (wmat.astype(jnp.bfloat16), s.astype(jnp.float32),
            b.astype(jnp.float32))


def prepare_params(raw):
    p = {}
    p["stem_w"], p["stem_s"], p["stem_b"] = _prep_conv(*raw["stem"],
                                                       cin_pad=None)
    layers = []
    for blocks_raw in raw["layers"]:
        blocks = []
        for blk_raw in blocks_raw:
            blk = {}
            blk["conv1_w"], blk["conv1_s"], blk["conv1_b"] = _prep_conv(
                *blk_raw["conv1"], cin_pad=LANE)
            blk["conv2_w"], blk["conv2_s"], blk["conv2_b"] = _prep_conv(
                *blk_raw["conv2"], cin_pad=LANE)
            if "down" in blk_raw:
                blk["down_w"], blk["down_s"], blk["down_b"] = _prep_conv(
                    *blk_raw["down"], cin_pad=LANE)
            blocks.append(blk)
        layers.append(blocks)
    p["layers"] = layers

    wfc, bfc = raw["fc"]
    num_classes, feat = wfc.shape
    np_ = _round_up(num_classes, LANE)
    kp = _round_up(feat, LANE)
    p["fc_w"] = jnp.pad(wfc.T, ((0, kp - feat),
                                (0, np_ - num_classes))).astype(jnp.bfloat16)
    p["fc_s"] = jnp.ones((1, np_), jnp.float32)
    p["fc_b"] = jnp.pad(bfc.reshape(1, -1),
                        ((0, 0), (0, np_ - num_classes))).astype(jnp.float32)
    return p


# ----------------------------------------------------------------------------
# Full forward: quant -> ResNet18 backbone -> dequant
# ----------------------------------------------------------------------------
def quantized_resnet18_forward(x_nchw, params, num_classes=10):
    x = jnp.transpose(x_nchw, (0, 2, 3, 1)).astype(jnp.float32)  # NHWC

    # QuantStub (fake-quantize) applied once to the raw input.
    x = fake_quant(x).astype(jnp.bfloat16)

    # stem conv 7x7/s2/p3 + folded BN + ReLU; output channels lane-padded.
    x = conv_bn(x, params["stem_w"], params["stem_s"], params["stem_b"],
                kh=7, kw=7, stride=2, pad=3, relu=True)
    x = maxpool_3x3_s2_p1(x)

    for li, blocks in enumerate(params["layers"]):
        for bi, blk in enumerate(blocks):
            stride = STRIDES[li] if bi == 0 else 1
            x = basic_block(x, blk, stride)

    # global average pool in f32 (padded channels are exactly zero)
    feat = jnp.mean(x.astype(jnp.float32), axis=(1, 2))          # (N, 128)
    logits = matmul_fused(feat, params["fc_w"], params["fc_s"],
                          params["fc_b"], relu=False,
                          out_dtype=jnp.float32)

    # DeQuantStub: identity on the float result.
    return logits[:, :num_classes]


if __name__ == "__main__":
    key = jax.random.PRNGKey(0)
    kx, kp = jax.random.split(key)
    x = jax.random.normal(kx, (2, 3, 16, 16), jnp.float32)  # NCHW like PyTorch
    raw = make_params(kp, in_ch=3, width=8, num_classes=10)
    params = prepare_params(raw)   # fold/transpose/pad/cast weights once

    fwd = jax.jit(quantized_resnet18_forward)
    out = fwd(x, params)
    out = jax.block_until_ready(out)
    assert out.shape == (2, 10) and out.dtype == jnp.float32
    assert bool(jnp.all(jnp.isfinite(out)))
    print("KERNEL_OK")
</pallas_src>

<mosaic_0001>
module attributes {stable_mosaic.version = 11 : i64} {
  func.func @_fq_kernel(%arg0: i32, %arg1: memref<16x128xf32, #tpu.memory_space<vmem>>, %arg2: memref<16x128xf32, #tpu.memory_space<vmem>>) attributes {dimension_semantics = [#tpu.dimension_semantics<parallel>], iteration_bounds = array<i64: 1>, scalar_prefetch = 0 : i64, scratch_operands = 0 : i64, tpu.core_type = #tpu.core_type<tc>, window_params = [{transform_indices = @transform_0, window_bounds = array<i64: 16, 128>}, {transform_indices = @transform_1, window_bounds = array<i64: 16, 128>}]} {
    %c0 = arith.constant 0 : index
    %c0_0 = arith.constant 0 : index
    %0 = vector.load %arg1[%c0, %c0_0] : memref<16x128xf32, #tpu.memory_space<vmem>>, vector<16x128xf32>
    %cst = arith.constant 2.000000e+01 : f32
    %1 = vector.broadcast %cst : f32 to vector<16x128xf32>
    %2 = arith.mulf %0, %1 : vector<16x128xf32>
    %3 = math.roundeven %2 : vector<16x128xf32>
    %cst_1 = arith.constant 1.280000e+02 : f32
    %4 = vector.broadcast %cst_1 : f32 to vector<16x128xf32>
    %5 = arith.addf %3, %4 : vector<16x128xf32>
    %cst_2 = arith.constant 0.000000e+00 : f32
    %cst_3 = arith.constant 2.550000e+02 : f32
    %6 = vector.broadcast %cst_2 : f32 to vector<16x128xf32>
    %7 = arith.maximumf %6, %5 : vector<16x128xf32>
    %8 = vector.broadcast %cst_3 : f32 to vector<16x128xf32>
    %9 = arith.minimumf %8, %7 : vector<16x128xf32>
    %cst_4 = arith.constant 1.280000e+02 : f32
    %10 = vector.broadcast %cst_4 : f32 to vector<16x128xf32>
    %11 = arith.subf %9, %10 : vector<16x128xf32>
    %cst_5 = arith.constant 5.000000e-02 : f32
    %12 = vector.broadcast %cst_5 : f32 to vector<16x128xf32>
    %13 = arith.mulf %11, %12 : vector<16x128xf32>
    %c0_6 = arith.constant 0 : index
    %c0_7 = arith.constant 0 : index
    %14 = vector.load %arg2[%c0_6, %c0_7] : memref<16x128xf32, #tpu.memory_space<vmem>>, vector<16x128xf32>
    tpu.vector_store %arg2[%c0_6, %c0_7], %13 {strides = array<i32>} : memref<16x128xf32, #tpu.memory_space<vmem>>, vector<16x128xf32>,
    return
  }
  func.func @transform_0(%arg0: i32) -> (i32, i32) {
    %c0_i32 = arith.constant 0 : i32
    %c0_i32_0 = arith.constant 0 : i32
    return %arg0, %c0_i32 : i32, i32
  }
  func.func @transform_1(%arg0: i32) -> (i32, i32) {
    %c0_i32 = arith.constant 0 : i32
    %c0_i32_0 = arith.constant 0 : i32
    return %arg0, %c0_i32 : i32, i32
  }
}

module attributes {stable_mosaic.version = 11 : i64} {
  func.func @_mm_kernel_1k(%arg0: i32, %arg1: i32, %arg2: memref<64x256xbf16, #tpu.memory_space<vmem>>, %arg3: memref<256x128xbf16, #tpu.memory_space<vmem>>, %arg4: memref<1x128xf32, #tpu.memory_space<vmem>>, %arg5: memref<1x128xf32, #tpu.memory_space<vmem>>, %arg6: memref<64x128xbf16, #tpu.memory_space<vmem>>) attributes {dimension_semantics = [#tpu.dimension_semantics<parallel>, #tpu.dimension_semantics<parallel>], iteration_bounds = array<i64: 2, 1>, scalar_prefetch = 0 : i64, scratch_operands = 0 : i64, tpu.core_type = #tpu.core_type<tc>, window_params = [{transform_indices = @transform_0, window_bounds = array<i64: 64, 256>}, {transform_indices = @transform_1, window_bounds = array<i64: 256, 128>}, {transform_indices = @transform_2, window_bounds = array<i64: 1, 128>}, {transform_indices = @transform_3, window_bounds = array<i64: 1, 128>}, {transform_indices = @transform_4, window_bounds = array<i64: 64, 128>}]} {
    %c0 = arith.constant 0 : index
    %c0_0 = arith.constant 0 : index
    %0 = vector.load %arg2[%c0, %c0_0] : memref<64x256xbf16, #tpu.memory_space<vmem>>, vector<64x256xbf16>
    %c0_1 = arith.constant 0 : index
    %c0_2 = arith.constant 0 : index
    %1 = vector.load %arg3[%c0_1, %c0_2] : memref<256x128xbf16, #tpu.memory_space<vmem>>, vector<256x128xbf16>
    %cst = arith.constant dense<0.000000e+00> : vector<64x128xf32>
    %2 = tpu.matmul %0, %1, %cst {dimension_numbers = #tpu.dot_dimension_numbers<[1], [0], [0], [1], [0, 0, 1, 1], [], []>} : vector<64x256xbf16>, vector<256x128xbf16>, vector<64x128xf32> -> vector<64x128xf32>
    %c0_3 = arith.constant 0 : index
    %c0_4 = arith.constant 0 : index
    %3 = vector.load %arg4[%c0_3, %c0_4] : memref<1x128xf32, #tpu.memory_space<vmem>>, vector<1x128xf32>
    %4 = vector.broadcast %3 : vector<1x128xf32> to vector<64x128xf32>
    %5 = arith.mulf %2, %4 : vector<64x128xf32>
    %c0_5 = arith.constant 0 : index
    %c0_6 = arith.constant 0 : index
    %6 = vector.load %arg5[%c0_5, %c0_6] : memref<1x128xf32, #tpu.memory_space<vmem>>, vector<1x128xf32>
    %7 = vector.broadcast %6 : vector<1x128xf32> to vector<64x128xf32>
    %8 = arith.addf %5, %7 : vector<64x128xf32>
    %cst_7 = arith.constant 0.000000e+00 : f32
    %9 = vector.broadcast %cst_7 : f32 to vector<64x128xf32>
    %10 = arith.maximumf %8, %9 : vector<64x128xf32>
    %11 = arith.truncf %10 : vector<64x128xf32> to vector<64x128xbf16>
    %c0_8 = arith.constant 0 : index
    %c0_9 = arith.constant 0 : index
    %12 = vector.load %arg6[%c0_8, %c0_9] : memref<64x128xbf16, #tpu.memory_space<vmem>>, vector<64x128xbf16>
    tpu.vector_store %arg6[%c0_8, %c0_9], %11 {strides = array<i32>} : memref<64x128xbf16, #tpu.memory_space<vmem>>, vector<64x128xbf16>,
    return
  }
  func.func @transform_0(%arg0: i32, %arg1: i32) -> (i32, i32) {
    %c0_i32 = arith.constant 0 : i32
    %c0_i32_0 = arith.constant 0 : i32
    return %arg0, %c0_i32 : i32, i32
  }
  func.func @transform_1(%arg0: i32, %arg1: i32) -> (i32, i32) {
    %c0_i32 = arith.constant 0 : i32
    %c0_i32_0 = arith.constant 0 : i32
    return %c0_i32, %arg1 : i32, i32
  }
  func.func @transform_2(%arg0: i32, %arg1: i32) -> (i32, i32) {
    %c0_i32 = arith.constant 0 : i32
    %c0_i32_0 = arith.constant 0 : i32
    return %c0_i32, %arg1 : i32, i32
  }
  func.func @transform_3(%arg0: i32, %arg1: i32) -> (i32, i32) {
    %c0_i32 = arith.constant 0 : i32
    %c0_i32_0 = arith.constant 0 : i32
    return %c0_i32, %arg1 : i32, i32
  }
  func.func @transform_4(%arg0: i32, %arg1: i32) -> (i32, i32) {
    %c0_i32 = arith.constant 0 : i32
    return %arg0, %arg1 : i32, i32
  }
}

module attributes {stable_mosaic.version = 11 : i64} {
  func.func @_max9_kernel(%arg0: i32, %arg1: memref<16x128xbf16, #tpu.memory_space<vmem>>, %arg2: memref<16x128xbf16, #tpu.memory_space<vmem>>, %arg3: memref<16x128xbf16, #tpu.memory_space<vmem>>, %arg4: memref<16x128xbf16, #tpu.memory_space<vmem>>, %arg5: memref<16x128xbf16, #tpu.memory_space<vmem>>, %arg6: memref<16x128xbf16, #tpu.memory_space<vmem>>, %arg7: memref<16x128xbf16, #tpu.memory_space<vmem>>, %arg8: memref<16x128xbf16, #tpu.memory_space<vmem>>, %arg9: memref<16x128xbf16, #tpu.memory_space<vmem>>, %arg10: memref<16x128xbf16, #tpu.memory_space<vmem>>) attributes {dimension_semantics = [#tpu.dimension_semantics<parallel>], iteration_bounds = array<i64: 2>, scalar_prefetch = 0 : i64, scratch_operands = 0 : i64, tpu.core_type = #tpu.core_type<tc>, window_params = [{transform_indices = @transform_0, window_bounds = array<i64: 16, 128>}, {transform_indices = @transform_1, window_bounds = array<i64: 16, 128>}, {transform_indices = @transform_2, window_bounds = array<i64: 16, 128>}, {transform_indices = @transform_3, window_bounds = array<i64: 16, 128>}, {transform_indices = @transform_4, window_bounds = array<i64: 16, 128>}, {transform_indices = @transform_5, window_bounds = array<i64: 16, 128>}, {transform_indices = @transform_6, window_bounds = array<i64: 16, 128>}, {transform_indices = @transform_7, window_bounds = array<i64: 16, 128>}, {transform_indices = @transform_8, window_bounds = array<i64: 16, 128>}, {transform_indices = @transform_9, window_bounds = array<i64: 16, 128>}]} {
    %c0 = arith.constant 0 : index
    %c0_0 = arith.constant 0 : index
    %0 = vector.load %arg1[%c0, %c0_0] : memref<16x128xbf16, #tpu.memory_space<vmem>>, vector<16x128xbf16>
    %c0_1 = arith.constant 0 : index
    %c0_2 = arith.constant 0 : index
    %1 = vector.load %arg2[%c0_1, %c0_2] : memref<16x128xbf16, #tpu.memory_space<vmem>>, vector<16x128xbf16>
    %2 = arith.maximumf %0, %1 : vector<16x128xbf16>
    %c0_3 = arith.constant 0 : index
    %c0_4 = arith.constant 0 : index
    %3 = vector.load %arg3[%c0_3, %c0_4] : memref<16x128xbf16, #tpu.memory_space<vmem>>, vector<16x128xbf16>
    %4 = arith.maximumf %2, %3 : vector<16x128xbf16>
    %c0_5 = arith.constant 0 : index
    %c0_6 = arith.constant 0 : index
    %5 = vector.load %arg4[%c0_5, %c0_6] : memref<16x128xbf16, #tpu.memory_space<vmem>>, vector<16x128xbf16>
    %6 = arith.maximumf %4, %5 : vector<16x128xbf16>
    %c0_7 = arith.constant 0 : index
    %c0_8 = arith.constant 0 : index
    %7 = vector.load %arg5[%c0_7, %c0_8] : memref<16x128xbf16, #tpu.memory_space<vmem>>, vector<16x128xbf16>
    %8 = arith.maximumf %6, %7 : vector<16x128xbf16>
    %c0_9 = arith.constant 0 : index
    %c0_10 = arith.constant 0 : index
    %9 = vector.load %arg6[%c0_9, %c0_10] : memref<16x128xbf16, #tpu.memory_space<vmem>>, vector<16x128xbf16>
    %10 = arith.maximumf %8, %9 : vector<16x128xbf16>
    %c0_11 = arith.constant 0 : index
    %c0_12 = arith.constant 0 : index
    %11 = vector.load %arg7[%c0_11, %c0_12] : memref<16x128xbf16, #tpu.memory_space<vmem>>, vector<16x128xbf16>
    %12 = arith.maximumf %10, %11 : vector<16x128xbf16>
    %c0_13 = arith.constant 0 : index
    %c0_14 = arith.constant 0 : index
    %13 = vector.load %arg8[%c0_13, %c0_14] : memref<16x128xbf16, #tpu.memory_space<vmem>>, vector<16x128xbf16>
    %14 = arith.maximumf %12, %13 : vector<16x128xbf16>
    %c0_15 = arith.constant 0 : index
    %c0_16 = arith.constant 0 : index
    %15 = vector.load %arg9[%c0_15, %c0_16] : memref<16x128xbf16, #tpu.memory_space<vmem>>, vector<16x128xbf16>
    %16 = arith.maximumf %14, %15 : vector<16x128xbf16>
    %c0_17 = arith.constant 0 : index
    %c0_18 = arith.constant 0 : index
    %17 = vector.load %arg10[%c0_17, %c0_18] : memref<16x128xbf16, #tpu.memory_space<vmem>>, vector<16x128xbf16>
    tpu.vector_store %arg10[%c0_17, %c0_18], %16 {strides = array<i32>} : memref<16x128xbf16, #tpu.memory_space<vmem>>, vector<16x128xbf16>,
    return
  }
  func.func @transform_0(%arg0: i32) -> (i32, i32) {
    %c0_i32 = arith.constant 0 : i32
    %c0_i32_0 = arith.constant 0 : i32
    return %arg0, %c0_i32 : i32, i32
  }
  func.func @transform_1(%arg0: i32) -> (i32, i32) {
    %c0_i32 = arith.constant 0 : i32
    %c0_i32_0 = arith.constant 0 : i32
    return %arg0, %c0_i32 : i32, i32
  }
  func.func @transform_2(%arg0: i32) -> (i32, i32) {
    %c0_i32 = arith.constant 0 : i32
    %c0_i32_0 = arith.constant 0 : i32
    return %arg0, %c0_i32 : i32, i32
  }
  func.func @transform_3(%arg0: i32) -> (i32, i32) {
    %c0_i32 = arith.constant 0 : i32
    %c0_i32_0 = arith.constant 0 : i32
    return %arg0, %c0_i32 : i32, i32
  }
  func.func @transform_4(%arg0: i32) -> (i32, i32) {
    %c0_i32 = arith.constant 0 : i32
    %c0_i32_0 = arith.constant 0 : i32
    return %arg0, %c0_i32 : i32, i32
  }
  func.func @transform_5(%arg0: i32) -> (i32, i32) {
    %c0_i32 = arith.constant 0 : i32
    %c0_i32_0 = arith.constant 0 : i32
    return %arg0, %c0_i32 : i32, i32
  }
  func.func @transform_6(%arg0: i32) -> (i32, i32) {
    %c0_i32 = arith.constant 0 : i32
    %c0_i32_0 = arith.constant 0 : i32
    return %arg0, %c0_i32 : i32, i32
  }
  func.func @transform_7(%arg0: i32) -> (i32, i32) {
    %c0_i32 = arith.constant 0 : i32
    %c0_i32_0 = arith.constant 0 : i32
    return %arg0, %c0_i32 : i32, i32
  }
  func.func @transform_8(%arg0: i32) -> (i32, i32) {
    %c0_i32 = arith.constant 0 : i32
    %c0_i32_0 = arith.constant 0 : i32
    return %arg0, %c0_i32 : i32, i32
  }
  func.func @transform_9(%arg0: i32) -> (i32, i32) {
    %c0_i32 = arith.constant 0 : i32
    %c0_i32_0 = arith.constant 0 : i32
    return %arg0, %c0_i32 : i32, i32
  }
}

module attributes {stable_mosaic.version = 11 : i64} {
  func.func @_mm_kernel_1k(%arg0: i32, %arg1: i32, %arg2: memref<16x1152xbf16, #tpu.memory_space<vmem>>, %arg3: memref<1152x128xbf16, #tpu.memory_space<vmem>>, %arg4: memref<1x128xf32, #tpu.memory_space<vmem>>, %arg5: memref<1x128xf32, #tpu.memory_space<vmem>>, %arg6: memref<16x128xbf16, #tpu.memory_space<vmem>>) attributes {dimension_semantics = [#tpu.dimension_semantics<parallel>, #tpu.dimension_semantics<parallel>], iteration_bounds = array<i64: 2, 1>, scalar_prefetch = 0 : i64, scratch_operands = 0 : i64, tpu.core_type = #tpu.core_type<tc>, window_params = [{transform_indices = @transform_0, window_bounds = array<i64: 16, 1152>}, {transform_indices = @transform_1, window_bounds = array<i64: 1152, 128>}, {transform_indices = @transform_2, window_bounds = array<i64: 1, 128>}, {transform_indices = @transform_3, window_bounds = array<i64: 1, 128>}, {transform_indices = @transform_4, window_bounds = array<i64: 16, 128>}]} {
    %c0 = arith.constant 0 : index
    %c0_0 = arith.constant 0 : index
    %0 = vector.load %arg2[%c0, %c0_0] : memref<16x1152xbf16, #tpu.memory_space<vmem>>, vector<16x1152xbf16>
    %c0_1 = arith.constant 0 : index
    %c0_2 = arith.constant 0 : index
    %1 = vector.load %arg3[%c0_1, %c0_2] : memref<1152x128xbf16, #tpu.memory_space<vmem>>, vector<1152x128xbf16>
    %cst = arith.constant dense<0.000000e+00> : vector<16x128xf32>
    %2 = tpu.matmul %0, %1, %cst {dimension_numbers = #tpu.dot_dimension_numbers<[1], [0], [0], [1], [0, 0, 1, 1], [], []>} : vector<16x1152xbf16>, vector<1152x128xbf16>, vector<16x128xf32> -> vector<16x128xf32>
    %c0_3 = arith.constant 0 : index
    %c0_4 = arith.constant 0 : index
    %3 = vector.load %arg4[%c0_3, %c0_4] : memref<1x128xf32, #tpu.memory_space<vmem>>, vector<1x128xf32>
    %4 = vector.broadcast %3 : vector<1x128xf32> to vector<16x128xf32>
    %5 = arith.mulf %2, %4 : vector<16x128xf32>
    %c0_5 = arith.constant 0 : index
    %c0_6 = arith.constant 0 : index
    %6 = vector.load %arg5[%c0_5, %c0_6] : memref<1x128xf32, #tpu.memory_space<vmem>>, vector<1x128xf32>
    %7 = vector.broadcast %6 : vector<1x128xf32> to vector<16x128xf32>
    %8 = arith.addf %5, %7 : vector<16x128xf32>
    %cst_7 = arith.constant 0.000000e+00 : f32
    %9 = vector.broadcast %cst_7 : f32 to vector<16x128xf32>
    %10 = arith.maximumf %8, %9 : vector<16x128xf32>
    %11 = arith.truncf %10 : vector<16x128xf32> to vector<16x128xbf16>
    %c0_8 = arith.constant 0 : index
    %c0_9 = arith.constant 0 : index
    %12 = vector.load %arg6[%c0_8, %c0_9] : memref<16x128xbf16, #tpu.memory_space<vmem>>, vector<16x128xbf16>
    tpu.vector_store %arg6[%c0_8, %c0_9], %11 {strides = array<i32>} : memref<16x128xbf16, #tpu.memory_space<vmem>>, vector<16x128xbf16>,
    return
  }
  func.func @transform_0(%arg0: i32, %arg1: i32) -> (i32, i32) {
    %c0_i32 = arith.constant 0 : i32
    %c0_i32_0 = arith.constant 0 : i32
    return %arg0, %c0_i32 : i32, i32
  }
  func.func @transform_1(%arg0: i32, %arg1: i32) -> (i32, i32) {
    %c0_i32 = arith.constant 0 : i32
    %c0_i32_0 = arith.constant 0 : i32
    return %c0_i32, %arg1 : i32, i32
  }
  func.func @transform_2(%arg0: i32, %arg1: i32) -> (i32, i32) {
    %c0_i32 = arith.constant 0 : i32
    %c0_i32_0 = arith.constant 0 : i32
    return %c0_i32, %arg1 : i32, i32
  }
  func.func @transform_3(%arg0: i32, %arg1: i32) -> (i32, i32) {
    %c0_i32 = arith.constant 0 : i32
    %c0_i32_0 = arith.constant 0 : i32
    return %c0_i32, %arg1 : i32, i32
  }
  func.func @transform_4(%arg0: i32, %arg1: i32) -> (i32, i32) {
    %c0_i32 = arith.constant 0 : i32
    return %arg0, %arg1 : i32, i32
  }
}

module attributes {stable_mosaic.version = 11 : i64} {
  func.func @_mm_kernel_1k(%arg0: i32, %arg1: i32, %arg2: memref<16x1152xbf16, #tpu.memory_space<vmem>>, %arg3: memref<1152x128xbf16, #tpu.memory_space<vmem>>, %arg4: memref<1x128xf32, #tpu.memory_space<vmem>>, %arg5: memref<1x128xf32, #tpu.memory_space<vmem>>, %arg6: memref<16x128xbf16, #tpu.memory_space<vmem>>, %arg7: memref<16x128xbf16, #tpu.memory_space<vmem>>) attributes {dimension_semantics = [#tpu.dimension_semantics<parallel>, #tpu.dimension_semantics<parallel>], iteration_bounds = array<i64: 2, 1>, scalar_prefetch = 0 : i64, scratch_operands = 0 : i64, tpu.core_type = #tpu.core_type<tc>, window_params = [{transform_indices = @transform_0, window_bounds = array<i64: 16, 1152>}, {transform_indices = @transform_1, window_bounds = array<i64: 1152, 128>}, {transform_indices = @transform_2, window_bounds = array<i64: 1, 128>}, {transform_indices = @transform_3, window_bounds = array<i64: 1, 128>}, {transform_indices = @transform_4, window_bounds = array<i64: 16, 128>}, {transform_indices = @transform_5, window_bounds = array<i64: 16, 128>}]} {
    %c0 = arith.constant 0 : index
    %c0_0 = arith.constant 0 : index
    %0 = vector.load %arg2[%c0, %c0_0] : memref<16x1152xbf16, #tpu.memory_space<vmem>>, vector<16x1152xbf16>
    %c0_1 = arith.constant 0 : index
    %c0_2 = arith.constant 0 : index
    %1 = vector.load %arg3[%c0_1, %c0_2] : memref<1152x128xbf16, #tpu.memory_space<vmem>>, vector<1152x128xbf16>
    %cst = arith.constant dense<0.000000e+00> : vector<16x128xf32>
    %2 = tpu.matmul %0, %1, %cst {dimension_numbers = #tpu.dot_dimension_numbers<[1], [0], [0], [1], [0, 0, 1, 1], [], []>} : vector<16x1152xbf16>, vector<1152x128xbf16>, vector<16x128xf32> -> vector<16x128xf32>
    %c0_3 = arith.constant 0 : index
    %c0_4 = arith.constant 0 : index
    %3 = vector.load %arg4[%c0_3, %c0_4] : memref<1x128xf32, #tpu.memory_space<vmem>>, vector<1x128xf32>
    %4 = vector.broadcast %3 : vector<1x128xf32> to vector<16x128xf32>
    %5 = arith.mulf %2, %4 : vector<16x128xf32>
    %c0_5 = arith.constant 0 : index
    %c0_6 = arith.constant 0 : index
    %6 = vector.load %arg5[%c0_5, %c0_6] : memref<1x128xf32, #tpu.memory_space<vmem>>, vector<1x128xf32>
    %7 = vector.broadcast %6 : vector<1x128xf32> to vector<16x128xf32>
    %8 = arith.addf %5, %7 : vector<16x128xf32>
    %c0_7 = arith.constant 0 : index
    %c0_8 = arith.constant 0 : index
    %9 = vector.load %arg6[%c0_7, %c0_8] : memref<16x128xbf16, #tpu.memory_space<vmem>>, vector<16x128xbf16>
    %10 = arith.extf %9 : vector<16x128xbf16> to vector<16x128xf32>
    %11 = arith.addf %8, %10 : vector<16x128xf32>
    %cst_9 = arith.constant 0.000000e+00 : f32
    %12 = vector.broadcast %cst_9 : f32 to vector<16x128xf32>
    %13 = arith.maximumf %11, %12 : vector<16x128xf32>
    %14 = arith.truncf %13 : vector<16x128xf32> to vector<16x128xbf16>
    %c0_10 = arith.constant 0 : index
    %c0_11 = arith.constant 0 : index
    %15 = vector.load %arg7[%c0_10, %c0_11] : memref<16x128xbf16, #tpu.memory_space<vmem>>, vector<16x128xbf16>
    tpu.vector_store %arg7[%c0_10, %c0_11], %14 {strides = array<i32>} : memref<16x128xbf16, #tpu.memory_space<vmem>>, vector<16x128xbf16>,
    return
  }
  func.func @transform_0(%arg0: i32, %arg1: i32) -> (i32, i32) {
    %c0_i32 = arith.constant 0 : i32
    %c0_i32_0 = arith.constant 0 : i32
    return %arg0, %c0_i32 : i32, i32
  }
  func.func @transform_1(%arg0: i32, %arg1: i32) -> (i32, i32) {
    %c0_i32 = arith.constant 0 : i32
    %c0_i32_0 = arith.constant 0 : i32
    return %c0_i32, %arg1 : i32, i32
  }
  func.func @transform_2(%arg0: i32, %arg1: i32) -> (i32, i32) {
    %c0_i32 = arith.constant 0 : i32
    %c0_i32_0 = arith.constant 0 : i32
    return %c0_i32, %arg1 : i32, i32
  }
  func.func @transform_3(%arg0: i32, %arg1: i32) -> (i32, i32) {
    %c0_i32 = arith.constant 0 : i32
    %c0_i32_0 = arith.constant 0 : i32
    return %c0_i32, %arg1 : i32, i32
  }
  func.func @transform_4(%arg0: i32, %arg1: i32) -> (i32, i32) {
    %c0_i32 = arith.constant 0 : i32
    return %arg0, %arg1 : i32, i32
  }
  func.func @transform_5(%arg0: i32, %arg1: i32) -> (i32, i32) {
    %c0_i32 = arith.constant 0 : i32
    return %arg0, %arg1 : i32, i32
  }
}

module attributes {stable_mosaic.version = 11 : i64} {
  func.func @_mm_kernel_1k(%arg0: i32, %arg1: i32, %arg2: memref<16x1152xbf16, #tpu.memory_space<vmem>>, %arg3: memref<1152x128xbf16, #tpu.memory_space<vmem>>, %arg4: memref<1x128xf32, #tpu.memory_space<vmem>>, %arg5: memref<1x128xf32, #tpu.memory_space<vmem>>, %arg6: memref<16x128xbf16, #tpu.memory_space<vmem>>) attributes {dimension_semantics = [#tpu.dimension_semantics<parallel>, #tpu.dimension_semantics<parallel>], iteration_bounds = array<i64: 1, 1>, scalar_prefetch = 0 : i64, scratch_operands = 0 : i64, tpu.core_type = #tpu.core_type<tc>, window_params = [{transform_indices = @transform_0, window_bounds = array<i64: 16, 1152>}, {transform_indices = @transform_1, window_bounds = array<i64: 1152, 128>}, {transform_indices = @transform_2, window_bounds = array<i64: 1, 128>}, {transform_indices = @transform_3, window_bounds = array<i64: 1, 128>}, {transform_indices = @transform_4, window_bounds = array<i64: 16, 128>}]} {
    %c0 = arith.constant 0 : index
    %c0_0 = arith.constant 0 : index
    %0 = vector.load %arg2[%c0, %c0_0] : memref<16x1152xbf16, #tpu.memory_space<vmem>>, vector<16x1152xbf16>
    %c0_1 = arith.constant 0 : index
    %c0_2 = arith.constant 0 : index
    %1 = vector.load %arg3[%c0_1, %c0_2] : memref<1152x128xbf16, #tpu.memory_space<vmem>>, vector<1152x128xbf16>
    %cst = arith.constant dense<0.000000e+00> : vector<16x128xf32>
    %2 = tpu.matmul %0, %1, %cst {dimension_numbers = #tpu.dot_dimension_numbers<[1], [0], [0], [1], [0, 0, 1, 1], [], []>} : vector<16x1152xbf16>, vector<1152x128xbf16>, vector<16x128xf32> -> vector<16x128xf32>
    %c0_3 = arith.constant 0 : index
    %c0_4 = arith.constant 0 : index
    %3 = vector.load %arg4[%c0_3, %c0_4] : memref<1x128xf32, #tpu.memory_space<vmem>>, vector<1x128xf32>
    %4 = vector.broadcast %3 : vector<1x128xf32> to vector<16x128xf32>
    %5 = arith.mulf %2, %4 : vector<16x128xf32>
    %c0_5 = arith.constant 0 : index
    %c0_6 = arith.constant 0 : index
    %6 = vector.load %arg5[%c0_5, %c0_6] : memref<1x128xf32, #tpu.memory_space<vmem>>, vector<1x128xf32>
    %7 = vector.broadcast %6 : vector<1x128xf32> to vector<16x128xf32>
    %8 = arith.addf %5, %7 : vector<16x128xf32>
    %cst_7 = arith.constant 0.000000e+00 : f32
    %9 = vector.broadcast %cst_7 : f32 to vector<16x128xf32>
    %10 = arith.maximumf %8, %9 : vector<16x128xf32>
    %11 = arith.truncf %10 : vector<16x128xf32> to vector<16x128xbf16>
    %c0_8 = arith.constant 0 : index
    %c0_9 = arith.constant 0 : index
    %12 = vector.load %arg6[%c0_8, %c0_9] : memref<16x128xbf16, #tpu.memory_space<vmem>>, vector<16x128xbf16>
    tpu.vector_store %arg6[%c0_8, %c0_9], %11 {strides = array<i32>} : memref<16x128xbf16, #tpu.memory_space<vmem>>, vector<16x128xbf16>,
    return
  }
  func.func @transform_0(%arg0: i32, %arg1: i32) -> (i32, i32) {
    %c0_i32 = arith.constant 0 : i32
    %c0_i32_0 = arith.constant 0 : i32
    return %arg0, %c0_i32 : i32, i32
  }
  func.func @transform_1(%arg0: i32, %arg1: i32) -> (i32, i32) {
    %c0_i32 = arith.constant 0 : i32
    %c0_i32_0 = arith.constant 0 : i32
    return %c0_i32, %arg1 : i32, i32
  }
  func.func @transform_2(%arg0: i32, %arg1: i32) -> (i32, i32) {
    %c0_i32 = arith.constant 0 : i32
    %c0_i32_0 = arith.constant 0 : i32
    return %c0_i32, %arg1 : i32, i32
  }
  func.func @transform_3(%arg0: i32, %arg1: i32) -> (i32, i32) {
    %c0_i32 = arith.constant 0 : i32
    %c0_i32_0 = arith.constant 0 : i32
    return %c0_i32, %arg1 : i32, i32
  }
  func.func @transform_4(%arg0: i32, %arg1: i32) -> (i32, i32) {
    %c0_i32 = arith.constant 0 : i32
    return %arg0, %arg1 : i32, i32
  }
}

module attributes {stable_mosaic.version = 11 : i64} {
  func.func @_mm_kernel_1k(%arg0: i32, %arg1: i32, %arg2: memref<16x128xbf16, #tpu.memory_space<vmem>>, %arg3: memref<128x128xbf16, #tpu.memory_space<vmem>>, %arg4: memref<1x128xf32, #tpu.memory_space<vmem>>, %arg5: memref<1x128xf32, #tpu.memory_space<vmem>>, %arg6: memref<16x128xbf16, #tpu.memory_space<vmem>>) attributes {dimension_semantics = [#tpu.dimension_semantics<parallel>, #tpu.dimension_semantics<parallel>], iteration_bounds = array<i64: 1, 1>, scalar_prefetch = 0 : i64, scratch_operands = 0 : i64, tpu.core_type = #tpu.core_type<tc>, window_params = [{transform_indices = @transform_0, window_bounds = array<i64: 16, 128>}, {transform_indices = @transform_1, window_bounds = array<i64: 128, 128>}, {transform_indices = @transform_2, window_bounds = array<i64: 1, 128>}, {transform_indices = @transform_3, window_bounds = array<i64: 1, 128>}, {transform_indices = @transform_4, window_bounds = array<i64: 16, 128>}]} {
    %c0 = arith.constant 0 : index
    %c0_0 = arith.constant 0 : index
    %0 = vector.load %arg2[%c0, %c0_0] : memref<16x128xbf16, #tpu.memory_space<vmem>>, vector<16x128xbf16>
    %c0_1 = arith.constant 0 : index
    %c0_2 = arith.constant 0 : index
    %1 = vector.load %arg3[%c0_1, %c0_2] : memref<128x128xbf16, #tpu.memory_space<vmem>>, vector<128x128xbf16>
    %cst = arith.constant dense<0.000000e+00> : vector<16x128xf32>
    %2 = tpu.matmul %0, %1, %cst {dimension_numbers = #tpu.dot_dimension_numbers<[1], [0], [0], [1], [0, 0, 1, 1], [], []>} : vector<16x128xbf16>, vector<128x128xbf16>, vector<16x128xf32> -> vector<16x128xf32>
    %c0_3 = arith.constant 0 : index
    %c0_4 = arith.constant 0 : index
    %3 = vector.load %arg4[%c0_3, %c0_4] : memref<1x128xf32, #tpu.memory_space<vmem>>, vector<1x128xf32>
    %4 = vector.broadcast %3 : vector<1x128xf32> to vector<16x128xf32>
    %5 = arith.mulf %2, %4 : vector<16x128xf32>
    %c0_5 = arith.constant 0 : index
    %c0_6 = arith.constant 0 : index
    %6 = vector.load %arg5[%c0_5, %c0_6] : memref<1x128xf32, #tpu.memory_space<vmem>>, vector<1x128xf32>
    %7 = vector.broadcast %6 : vector<1x128xf32> to vector<16x128xf32>
    %8 = arith.addf %5, %7 : vector<16x128xf32>
    %9 = arith.truncf %8 : vector<16x128xf32> to vector<16x128xbf16>
    %c0_7 = arith.constant 0 : index
    %c0_8 = arith.constant 0 : index
    %10 = vector.load %arg6[%c0_7, %c0_8] : memref<16x128xbf16, #tpu.memory_space<vmem>>, vector<16x128xbf16>
    tpu.vector_store %arg6[%c0_7, %c0_8], %9 {strides = array<i32>} : memref<16x128xbf16, #tpu.memory_space<vmem>>, vector<16x128xbf16>,
    return
  }
  func.func @transform_0(%arg0: i32, %arg1: i32) -> (i32, i32) {
    %c0_i32 = arith.constant 0 : i32
    %c0_i32_0 = arith.constant 0 : i32
    return %arg0, %c0_i32 : i32, i32
  }
  func.func @transform_1(%arg0: i32, %arg1: i32) -> (i32, i32) {
    %c0_i32 = arith.constant 0 : i32
    %c0_i32_0 = arith.constant 0 : i32
    return %c0_i32, %arg1 : i32, i32
  }
  func.func @transform_2(%arg0: i32, %arg1: i32) -> (i32, i32) {
    %c0_i32 = arith.constant 0 : i32
    %c0_i32_0 = arith.constant 0 : i32
    return %c0_i32, %arg1 : i32, i32
  }
  func.func @transform_3(%arg0: i32, %arg1: i32) -> (i32, i32) {
    %c0_i32 = arith.constant 0 : i32
    %c0_i32_0 = arith.constant 0 : i32
    return %c0_i32, %arg1 : i32, i32
  }
  func.func @transform_4(%arg0: i32, %arg1: i32) -> (i32, i32) {
    %c0_i32 = arith.constant 0 : i32
    return %arg0, %arg1 : i32, i32
  }
}

module attributes {stable_mosaic.version = 11 : i64} {
  func.func @_mm_kernel_1k(%arg0: i32, %arg1: i32, %arg2: memref<16x1152xbf16, #tpu.memory_space<vmem>>, %arg3: memref<1152x128xbf16, #tpu.memory_space<vmem>>, %arg4: memref<1x128xf32, #tpu.memory_space<vmem>>, %arg5: memref<1x128xf32, #tpu.memory_space<vmem>>, %arg6: memref<16x128xbf16, #tpu.memory_space<vmem>>, %arg7: memref<16x128xbf16, #tpu.memory_space<vmem>>) attributes {dimension_semantics = [#tpu.dimension_semantics<parallel>, #tpu.dimension_semantics<parallel>], iteration_bounds = array<i64: 1, 1>, scalar_prefetch = 0 : i64, scratch_operands = 0 : i64, tpu.core_type = #tpu.core_type<tc>, window_params = [{transform_indices = @transform_0, window_bounds = array<i64: 16, 1152>}, {transform_indices = @transform_1, window_bounds = array<i64: 1152, 128>}, {transform_indices = @transform_2, window_bounds = array<i64: 1, 128>}, {transform_indices = @transform_3, window_bounds = array<i64: 1, 128>}, {transform_indices = @transform_4, window_bounds = array<i64: 16, 128>}, {transform_indices = @transform_5, window_bounds = array<i64: 16, 128>}]} {
    %c0 = arith.constant 0 : index
    %c0_0 = arith.constant 0 : index
    %0 = vector.load %arg2[%c0, %c0_0] : memref<16x1152xbf16, #tpu.memory_space<vmem>>, vector<16x1152xbf16>
    %c0_1 = arith.constant 0 : index
    %c0_2 = arith.constant 0 : index
    %1 = vector.load %arg3[%c0_1, %c0_2] : memref<1152x128xbf16, #tpu.memory_space<vmem>>, vector<1152x128xbf16>
    %cst = arith.constant dense<0.000000e+00> : vector<16x128xf32>
    %2 = tpu.matmul %0, %1, %cst {dimension_numbers = #tpu.dot_dimension_numbers<[1], [0], [0], [1], [0, 0, 1, 1], [], []>} : vector<16x1152xbf16>, vector<1152x128xbf16>, vector<16x128xf32> -> vector<16x128xf32>
    %c0_3 = arith.constant 0 : index
    %c0_4 = arith.constant 0 : index
    %3 = vector.load %arg4[%c0_3, %c0_4] : memref<1x128xf32, #tpu.memory_space<vmem>>, vector<1x128xf32>
    %4 = vector.broadcast %3 : vector<1x128xf32> to vector<16x128xf32>
    %5 = arith.mulf %2, %4 : vector<16x128xf32>
    %c0_5 = arith.constant 0 : index
    %c0_6 = arith.constant 0 : index
    %6 = vector.load %arg5[%c0_5, %c0_6] : memref<1x128xf32, #tpu.memory_space<vmem>>, vector<1x128xf32>
    %7 = vector.broadcast %6 : vector<1x128xf32> to vector<16x128xf32>
    %8 = arith.addf %5, %7 : vector<16x128xf32>
    %c0_7 = arith.constant 0 : index
    %c0_8 = arith.constant 0 : index
    %9 = vector.load %arg6[%c0_7, %c0_8] : memref<16x128xbf16, #tpu.memory_space<vmem>>, vector<16x128xbf16>
    %10 = arith.extf %9 : vector<16x128xbf16> to vector<16x128xf32>
    %11 = arith.addf %8, %10 : vector<16x128xf32>
    %cst_9 = arith.constant 0.000000e+00 : f32
    %12 = vector.broadcast %cst_9 : f32 to vector<16x128xf32>
    %13 = arith.maximumf %11, %12 : vector<16x128xf32>
    %14 = arith.truncf %13 : vector<16x128xf32> to vector<16x128xbf16>
    %c0_10 = arith.constant 0 : index
    %c0_11 = arith.constant 0 : index
    %15 = vector.load %arg7[%c0_10, %c0_11] : memref<16x128xbf16, #tpu.memory_space<vmem>>, vector<16x128xbf16>
    tpu.vector_store %arg7[%c0_10, %c0_11], %14 {strides = array<i32>} : memref<16x128xbf16, #tpu.memory_space<vmem>>, vector<16x128xbf16>,
    return
  }
  func.func @transform_0(%arg0: i32, %arg1: i32) -> (i32, i32) {
    %c0_i32 = arith.constant 0 : i32
    %c0_i32_0 = arith.constant 0 : i32
    return %arg0, %c0_i32 : i32, i32
  }
  func.func @transform_1(%arg0: i32, %arg1: i32) -> (i32, i32) {
    %c0_i32 = arith.constant 0 : i32
    %c0_i32_0 = arith.constant 0 : i32
    return %c0_i32, %arg1 : i32, i32
  }
  func.func @transform_2(%arg0: i32, %arg1: i32) -> (i32, i32) {
    %c0_i32 = arith.constant 0 : i32
    %c0_i32_0 = arith.constant 0 : i32
    return %c0_i32, %arg1 : i32, i32
  }
  func.func @transform_3(%arg0: i32, %arg1: i32) -> (i32, i32) {
    %c0_i32 = arith.constant 0 : i32
    %c0_i32_0 = arith.constant 0 : i32
    return %c0_i32, %arg1 : i32, i32
  }
  func.func @transform_4(%arg0: i32, %arg1: i32) -> (i32, i32) {
    %c0_i32 = arith.constant 0 : i32
    return %arg0, %arg1 : i32, i32
  }
  func.func @transform_5(%arg0: i32, %arg1: i32) -> (i32, i32) {
    %c0_i32 = arith.constant 0 : i32
    return %arg0, %arg1 : i32, i32
  }
}

module attributes {stable_mosaic.version = 11 : i64} {
  func.func @_mm_kernel_1k(%arg0: i32, %arg1: i32, %arg2: memref<16x128xbf16, #tpu.memory_space<vmem>>, %arg3: memref<128x128xbf16, #tpu.memory_space<vmem>>, %arg4: memref<1x128xf32, #tpu.memory_space<vmem>>, %arg5: memref<1x128xf32, #tpu.memory_space<vmem>>, %arg6: memref<16x128xf32, #tpu.memory_space<vmem>>) attributes {dimension_semantics = [#tpu.dimension_semantics<parallel>, #tpu.dimension_semantics<parallel>], iteration_bounds = array<i64: 1, 1>, scalar_prefetch = 0 : i64, scratch_operands = 0 : i64, tpu.core_type = #tpu.core_type<tc>, window_params = [{transform_indices = @transform_0, window_bounds = array<i64: 16, 128>}, {transform_indices = @transform_1, window_bounds = array<i64: 128, 128>}, {transform_indices = @transform_2, window_bounds = array<i64: 1, 128>}, {transform_indices = @transform_3, window_bounds = array<i64: 1, 128>}, {transform_indices = @transform_4, window_bounds = array<i64: 16, 128>}]} {
    %c0 = arith.constant 0 : index
    %c0_0 = arith.constant 0 : index
    %0 = vector.load %arg2[%c0, %c0_0] : memref<16x128xbf16, #tpu.memory_space<vmem>>, vector<16x128xbf16>
    %c0_1 = arith.constant 0 : index
    %c0_2 = arith.constant 0 : index
    %1 = vector.load %arg3[%c0_1, %c0_2] : memref<128x128xbf16, #tpu.memory_space<vmem>>, vector<128x128xbf16>
    %cst = arith.constant dense<0.000000e+00> : vector<16x128xf32>
    %2 = tpu.matmul %0, %1, %cst {dimension_numbers = #tpu.dot_dimension_numbers<[1], [0], [0], [1], [0, 0, 1, 1], [], []>} : vector<16x128xbf16>, vector<128x128xbf16>, vector<16x128xf32> -> vector<16x128xf32>
    %c0_3 = arith.constant 0 : index
    %c0_4 = arith.constant 0 : index
    %3 = vector.load %arg4[%c0_3, %c0_4] : memref<1x128xf32, #tpu.memory_space<vmem>>, vector<1x128xf32>
    %4 = vector.broadcast %3 : vector<1x128xf32> to vector<16x128xf32>
    %5 = arith.mulf %2, %4 : vector<16x128xf32>
    %c0_5 = arith.constant 0 : index
    %c0_6 = arith.constant 0 : index
    %6 = vector.load %arg5[%c0_5, %c0_6] : memref<1x128xf32, #tpu.memory_space<vmem>>, vector<1x128xf32>
    %7 = vector.broadcast %6 : vector<1x128xf32> to vector<16x128xf32>
    %8 = arith.addf %5, %7 : vector<16x128xf32>
    %c0_7 = arith.constant 0 : index
    %c0_8 = arith.constant 0 : index
    %9 = vector.load %arg6[%c0_7, %c0_8] : memref<16x128xf32, #tpu.memory_space<vmem>>, vector<16x128xf32>
    tpu.vector_store %arg6[%c0_7, %c0_8], %8 {strides = array<i32>} : memref<16x128xf32, #tpu.memory_space<vmem>>, vector<16x128xf32>,
    return
  }
  func.func @transform_0(%arg0: i32, %arg1: i32) -> (i32, i32) {
    %c0_i32 = arith.constant 0 : i32
    %c0_i32_0 = arith.constant 0 : i32
    return %arg0, %c0_i32 : i32, i32
  }
  func.func @transform_1(%arg0: i32, %arg1: i32) -> (i32, i32) {
    %c0_i32 = arith.constant 0 : i32
    %c0_i32_0 = arith.constant 0 : i32
    return %c0_i32, %arg1 : i32, i32
  }
  func.func @transform_2(%arg0: i32, %arg1: i32) -> (i32, i32) {
    %c0_i32 = arith.constant 0 : i32
    %c0_i32_0 = arith.constant 0 : i32
    return %c0_i32, %arg1 : i32, i32
  }
  func.func @transform_3(%arg0: i32, %arg1: i32) -> (i32, i32) {
    %c0_i32 = arith.constant 0 : i32
    %c0_i32_0 = arith.constant 0 : i32
    return %c0_i32, %arg1 : i32, i32
  }
  func.func @transform_4(%arg0: i32, %arg1: i32) -> (i32, i32) {
    %c0_i32 = arith.constant 0 : i32
    return %arg0, %arg1 : i32, i32
  }
}

</mosaic_0001>

<bundles_post_ra>
// kernel: quantized_resnet18_forward.23
= control target key start
LH: loop header
LB: loop body
LE: loop exit
PB: predicated region body
PF: predicated region fallthrough
CT: control target
= control target key end

     0   :  { %s70_s0 = inlined_call_operand.vmem [shape: f32[16,128], index: 0, kind: input, shape index: {}]   ;;  %s71_s1 = inlined_call_operand.vmem [shape: f32[16,128], index: 1, kind: output, shape index: {}]  }
   0x1   :  { %v8_v0 = vld [vmem:[%s70_s0] sm:$0xff]  ;;  %v9_v1 = vld [vmem:[%s70_s0 + $0x8] sm:$0xff] }
   0x2   :  { %v10_v2 = vmul.f32 20.0, %v8_v0  ;;  %v11_v3 = vmul.f32 20.0, %v9_v1 }
   0x4   :  { %v34_v4 = vcvt.f32.s32 %v10_v2  ;;  %v32_v5 = vand.u32 2147483647, %v10_v2  ;;  %v42_v6 = vcvt.f32.s32 %v11_v3  ;;  %v37_v8 = vand.u32 2147483648, %v10_v2 }
   0x5   :  { %v40_v9 = vand.u32 2147483647, %v11_v3  ;;  %v45_v11 = vand.u32 2147483648, %v11_v3 }
   0x6   :  { %v35_v7 = vcvt.s32.f32 %v34_v4  ;;  %v43_v10 = vcvt.s32.f32 %v42_v6  ;;  %vm33_vm0 = vcmp.lt.f32.partialorder %v32_v5, 8388608.0 }
   0x7   :  { %vm41_vm1 = vcmp.lt.f32.partialorder %v40_v9, 8388608.0 }
   0x8   :  { %v36_v12 = vand.u32 2147483647, %v35_v7  ;;  %v44_v13 = vand.u32 2147483647, %v43_v10 }
   0xa   :  { %v38_v14 = vor.u32 %v37_v8, %v36_v12  ;;  %v46_v15 = vor.u32 %v45_v11, %v44_v13 }
   0xc   :  { %v39_v16 = vsel %vm33_vm0, %v38_v14, %v10_v2  ;;  %v47_v18 = vsel %vm41_vm1, %v46_v15, %v11_v3 }
   0xd   :  { %v14_v17 = vadd.f32 128.0, %v39_v16  ;;  %v15_v19 = vadd.f32 128.0, %v47_v18 }
   0xf   :  { %v16_v20 = vmax.f32 %v14_v17, 0.0  ;;  %v17_v21 = vmax.f32 %v15_v19, 0.0 }
  0x11   :  { %v18_v22 = vmin.f32 %v16_v20, 255.0  ;;  %v19_v23 = vmin.f32 %v17_v21, 255.0 }
  0x13   :  { %v30_v24 = vadd.f32 -128.0, %v18_v22  ;;  %v31_v25 = vadd.f32 -128.0, %v19_v23 }
  0x15   :  { %v22_v26 = vmul.f32 0.05, %v30_v24  ;;  %v23_v27 = vmul.f32 0.05, %v31_v25 }
  0x17   :  { %24 = vst [vmem:[%s71_s1] sm:$0xff] %v22_v26  ;;  %25 = vst [vmem:[%s71_s1 + $0x8] sm:$0xff] %v23_v27 }

// kernel: quantized_resnet18_forward.24
= control target key start
LH: loop header
LB: loop body
LE: loop exit
PB: predicated region body
PF: predicated region fallthrough
CT: control target
= control target key end

     0   :  { %s941_s15 = smov 0   ;;  %s943_s16 = smov 0   ;;  %s1042_s0 = inlined_call_operand.vmem [shape: bf16[128,256], index: 0, kind: input, shape index: {}]   ;;  %s1043_s1 = inlined_call_operand.vmem [shape: bf16[256,128], index: 1, kind: input, shape index: {}]   ;;  %s1044_s2 = inlined_call_operand.vmem [shape: f32[1,128], index: 2, kind: input, shape index: {}]   ;;  %s1045_s3 = inlined_call_operand.vmem [shape: f32[1,128], index: 3, kind: input, shape index: {}]   ;;  %s1046_s4 = inlined_call_operand.vmem [shape: bf16[128,128], index: 4, kind: output, shape index: {}]  }
   0x1   :  { %s945_s17 = smov 0  }
   0x2 LB: > { %s26_s18 = sadd.s32 1, %s910_s16  ;;  %p710_p0 = scmp.ge.s32.totalorder %s914_s17, 1  ;;  %s914_s17 = sphi %s945_s17, %s14_s17   ;;  %s910_s16 = sphi %s943_s16, %s1048_s16   ;;  %s906_s15 = sphi %s941_s15, %s1047_s15  }
   0x3   : > { %p28_p1 = scmp.ge.s32.totalorder %s26_s18, 2  ;;  %p203_p2 = scmp.lt.s32.totalorder %s914_s17, 3 }
   0x5   : > { %s1050_s18 = smov (%p28_p1, %s26_s18), 0  ;;  %p204_p3 = pnand %p710_p0, %p203_p2 }
   0x6   : > { %s711_s21 = sshll.u32 (!%p204_p3), %s906_s15, 3 }
   0x7   : > { %207 = sbr.rel (%p204_p3) target bundleno = 263 (0x107), region = 36  ;;  %p244_p4 = scmp.lt.s32.totalorder (!%p204_p3), %s711_s21, 15 }
   0xc   : > { %v864_v0 = vld [vmem:[%s1043_s1 + $0x78] sm:$0xff]   ;;  %v866_v2 = vld [vmem:[%s1043_s1 + $0x70] sm:$0xff]   ;;  %v868_v4 = vld [vmem:[%s1043_s1 + $0x68] sm:$0xff]   ;;  %s1052_s21 = smov (!%p244_p4, %s711_s21), 15 }
   0xd   : > { %v865_v1 = vld [vmem:[%s1043_s1 + $0x38] sm:$0xff]   ;;  %784 = vmatprep.subr.bf16.mxu0 %v864_v0  ;;  %824 = vmatprep.subr.bf16.mxu1 %v864_v0  ;;  %v867_v3 = vld [vmem:[%s1043_s1 + $0x30] sm:$0xff]   ;;  %v869_v5 = vld [vmem:[%s1043_s1 + $0x28] sm:$0xff]   ;;  %s752_s10 = sshll.u32 %s1052_s21, 3  ;;  %s715_s12 = sshll.u32 %s1052_s21, 2 }
   0xe   : > { %785 = vmatpush3.bf16.msra.mxu0 %v865_v1  ;;  %832 = vmatpush3.bf16.msra.mxu1 %v865_v1  ;;  %v870_v6 = vld [vmem:[%s1043_s1 + $0x60] sm:$0xff]   ;;  %v872_v8 = vld [vmem:[%s1043_s1 + $0x58] sm:$0xff]   ;;  %s992_s15 = scalar_lea.vmem %s1042_s0, %s752_s10  ;;  %v874_v10 = vld [vmem:[%s1043_s1 + $0x50] sm:$0xff]  }
   0xf   : > { %786 = vmatprep.subr.bf16.mxu0 %v866_v2  ;;  %825 = vmatprep.subr.bf16.mxu1 %v866_v2  ;;  %v871_v7 = vld [vmem:[%s1043_s1 + $0x20] sm:$0xff]   ;;  %v873_v9 = vld [vmem:[%s1043_s1 + $0x18] sm:$0xff]   ;;  %v875_v13 = vld [vmem:[%s1043_s1 + $0x10] sm:$0xff]  }
  0x10   : > { %v882_v11 = vld [vmem:[%s992_s15 + $0x4] ss:$8 sps:$4 sm:$0xff]   ;;  %v880_v18 = vld [vmem:[%s992_s15] ss:$8 sps:$4 sm:$0xff]   ;;  %v886_v20 = vld [vmem:[%s992_s15 + $0x14] ss:$8 sps:$4 sm:$0xff]  }
  0x11   : > { %v885_v12 = vld [vmem:[%s992_s15 + $0x24] ss:$8 sps:$4 sm:$0xff]   ;;  %478 = vmatprep.mubr.bf16.mxu0 %v882_v11  ;;  %v883_v19 = vld [vmem:[%s992_s15 + $0x20] ss:$8 sps:$4 sm:$0xff]   ;;  %v888_v21 = vld [vmem:[%s992_s15 + $0x34] ss:$8 sps:$4 sm:$0xff]  }
  0x12   : > { %787 = vmatpush3.bf16.msra.mxu0 %v867_v3  ;;  %833 = vmatpush3.bf16.msra.mxu1 %v867_v3  ;;  %v876_v14 = vld [vmem:[%s1043_s1 + $0x48] sm:$0xff]   ;;  %v878_v16 = vld [vmem:[%s1043_s1 + $0x40] sm:$0xff]   ;;  %v890_v22 = vld [vmem:[%s992_s15 + $0x10] ss:$8 sps:$4 sm:$0xff]  }
  0x13   : > { %788 = vmatprep.subr.bf16.mxu0 %v868_v4  ;;  %826 = vmatprep.subr.bf16.mxu1 %v868_v4  ;;  %v877_v15 = vld [vmem:[%s1043_s1 + $0x8] sm:$0xff]   ;;  %v879_v17 = vld [vmem:[%s1043_s1] sm:$0xff]   ;;  %v891_v23 = vld [vmem:[%s992_s15 + $0x30] ss:$8 sps:$4 sm:$0xff]   ;;  %s267_s15 = scalar_lea.vmem %s1046_s4, %s715_s12 }
  0x14   : > { %494 = vmatprep.mubr.bf16.mxu1 %v885_v12  ;;  %v740_v27 = vld [vmem:[%s1044_s2] ss:$0 sm:$0xff] }
  0x15   : > { %v741_v35 = vld [vmem:[%s1045_s3] ss:$0 sm:$0xff] }
  0x16   : > { %789 = vmatpush3.bf16.msra.mxu0 %v869_v5  ;;  %834 = vmatpush3.bf16.msra.mxu1 %v869_v5 }
  0x17   : > { %790 = vmatprep.subr.bf16.mxu0 %v870_v6  ;;  %827 = vmatprep.subr.bf16.mxu1 %v870_v6 }
  0x1a   : > { %791 = vmatpush3.bf16.msra.mxu0 %v871_v7  ;;  %835 = vmatpush3.bf16.msra.mxu1 %v871_v7 }
  0x1b   : > { %792 = vmatprep.subr.bf16.mxu0 %v872_v8  ;;  %828 = vmatprep.subr.bf16.mxu1 %v872_v8 }
  0x1e   : > { %793 = vmatpush3.bf16.msra.mxu0 %v873_v9  ;;  %836 = vmatpush3.bf16.msra.mxu1 %v873_v9 }
  0x1f   : > { %794 = vmatprep.subr.bf16.mxu0 %v874_v10  ;;  %829 = vmatprep.subr.bf16.mxu1 %v874_v10 }
  0x22   : > { %795 = vmatpush3.bf16.msra.mxu0 %v875_v13  ;;  %837 = vmatpush3.bf16.msra.mxu1 %v875_v13 }
  0x23   : > { %796 = vmatprep.subr.bf16.mxu0 %v876_v14  ;;  %830 = vmatprep.subr.bf16.mxu1 %v876_v14 }
  0x26   : > { %797 = vmatpush3.bf16.msra.mxu0 %v877_v15  ;;  %838 = vmatpush3.bf16.msra.mxu1 %v877_v15 }
  0x27   : > { %798 = vmatprep.subr.bf16.mxu0 %v878_v16  ;;  %831 = vmatprep.subr.bf16.mxu1 %v878_v16 }
  0x2a   : > { %799 = vmatpush3.bf16.msra.mxu0 %v879_v17  ;;  %839 = vmatpush3.bf16.msra.mxu1 %v879_v17 }
  0x2d   : > { %479 = vmatmul.mubr.bf16.vlgmr.msra.gmra.mxu0 %v880_v18  ;;  %495 = vmatmul.mubr.bf16.vlgmr.msra.gmra.mxu1 %v883_v19 }
  0x2e   : > { %486 = vmatprep.mubr.bf16.mxu0 %v886_v20  ;;  %502 = vmatprep.mubr.bf16.mxu1 %v888_v21 }
  0x35   : > { %487 = vmatmul.mubr.bf16.gmra.mxu0 %v890_v22  ;;  %503 = vmatmul.mubr.bf16.gmra.mxu1 %v891_v23 }
  0xed   : > { %v800_v24 = vpop.f32.mrf.mxu0  ;;  %v812_v25 = vpop.f32.mrf.mxu1 }
  0xef   : > { %v801_v26 = vpop.f32.mrf.mxu0  ;;  %v813_v28 = vpop.f32.mrf.mxu1 }
  0xf0   : > { %v802_v29 = vadd.f32 %v801_v26, %v800_v24  ;;  %v814_v30 = vadd.f32 %v813_v28, %v812_v25 }
  0xf1   : > { %v803_v31 = vpop.f32.mrf.mxu0  ;;  %v815_v32 = vpop.f32.mrf.mxu1 }
  0xf2   : > { %v518_v33 = vmul.f32 %v802_v29, %v740_v27  ;;  %v522_v34 = vmul.f32 %v814_v30, %v740_v27 }
  0xf3   : > { %v804_v36 = vpop.f32.mrf.mxu0  ;;  %v816_v37 = vpop.f32.mrf.mxu1 }
  0xf4   : > { %v805_v38 = vadd.f32 %v804_v36, %v803_v31  ;;  %v817_v39 = vadd.f32 %v816_v37, %v815_v32  ;;  %v533_v42 = vadd.f32 %v741_v35, %v518_v33  ;;  %v537_v43 = vadd.f32 %v741_v35, %v522_v34 }
  0xf5   : > { %v806_v40 = vpop.f32.mrf.mxu0  ;;  %v818_v41 = vpop.f32.mrf.mxu1 }
  0xf6   : > { %v519_v44 = vmul.f32 %v805_v38, %v740_v27  ;;  %v523_v45 = vmul.f32 %v817_v39, %v740_v27  ;;  %v541_v54 = vmax.f32 %v533_v42, 0.0  ;;  %v545_v55 = vmax.f32 %v537_v43, 0.0 }
  0xf7   : > { %v807_v46 = vpop.f32.mrf.mxu0  ;;  %v819_v47 = vpop.f32.mrf.mxu1 }
  0xf8   : > { %v534_v48 = vadd.f32 %v741_v35, %v519_v44  ;;  %v538_v49 = vadd.f32 %v741_v35, %v523_v45  ;;  %v808_v50 = vadd.f32 %v807_v46, %v806_v40  ;;  %v820_v51 = vadd.f32 %v819_v47, %v818_v41 }
  0xf9   : > { %v809_v52 = vpop.f32.mrf.mxu0  ;;  %v821_v53 = vpop.f32.mrf.mxu1 }
  0xfa   : > { %v542_v56 = vmax.f32 %v534_v48, 0.0  ;;  %v546_v57 = vmax.f32 %v538_v49, 0.0  ;;  %v520_v58 = vmul.f32 %v808_v50, %v740_v27  ;;  %v524_v59 = vmul.f32 %v820_v51, %v740_v27 }
  0xfb   : > { %v810_v60 = vpop.f32.mrf.mxu0  ;;  %v822_v61 = vpop.f32.mrf.mxu1 }
  0xfc   : > { %v764_v62 = vpack.c.bf16 %v542_v56, %v541_v54  ;;  %v774_v63 = vpack.c.bf16 %v546_v57, %v545_v55  ;;  %v811_v0 = vadd.f32 %v810_v60, %v809_v52  ;;  %v823_v1 = vadd.f32 %v822_v61, %v821_v53 }
  0xfd   : > { %v535_v2 = vadd.f32 %v741_v35, %v520_v58  ;;  %v539_v3 = vadd.f32 %v741_v35, %v524_v59 }
  0xfe   : > { %765 = vst [vmem:[%s267_s15] sm:$0xff] %v764_v62   ;;  %782 = vst [vmem:[%s267_s15 + $0x10] sm:$0xff] %v774_v63   ;;  %v521_v4 = vmul.f32 %v811_v0, %v740_v27  ;;  %v525_v5 = vmul.f32 %v823_v1, %v740_v27 }
  0xff   : > { %v543_v8 = vmax.f32 %v535_v2, 0.0  ;;  %v547_v9 = vmax.f32 %v539_v3, 0.0 }
 0x100   : > { %v536_v6 = vadd.f32 %v741_v35, %v521_v4  ;;  %v540_v7 = vadd.f32 %v741_v35, %v525_v5 }
 0x102   : > { %v544_v10 = vmax.f32 %v536_v6, 0.0  ;;  %v548_v11 = vmax.f32 %v540_v7, 0.0 }
 0x104   : > { %v769_v12 = vpack.c.bf16 %v544_v10, %v543_v8  ;;  %v779_v13 = vpack.c.bf16 %v548_v11, %v547_v9 }
 0x106   : > { %781 = vst [vmem:[%s267_s15 + $0x8] sm:$0xff] %v769_v12   ;;  %783 = vst [vmem:[%s267_s15 + $0x18] sm:$0xff] %v779_v13  }
 0x107 PF: > { %s14_s17 = sadd.s32 1, %s914_s17   ;;  %s1047_s15 = smov %s910_s16 }
 0x108   : > { %p11_p5 = scmp.ge.s32.totalorder %s14_s17, 4   ;;  %s1048_s16 = smov %s1050_s18 }
 0x10a   :  { %13 = sbr.rel (!%p11_p5) target bundleno = 2 (0x2), region = 75 }

// kernel: quantized_resnet18_forward.25
= control target key start
LH: loop header
LB: loop body
LE: loop exit
PB: predicated region body
PF: predicated region fallthrough
CT: control target
= control target key end

     0   :  { %s799_s30 = smov 0   ;;  %s852_s0 = inlined_call_operand.vmem [shape: bf16[32,128], index: 0, kind: input, shape index: {}]   ;;  %s853_s1 = inlined_call_operand.vmem [shape: bf16[32,128], index: 1, kind: input, shape index: {}]   ;;  %s854_s2 = inlined_call_operand.vmem [shape: bf16[32,128], index: 2, kind: input, shape index: {}]   ;;  %s855_s3 = inlined_call_operand.vmem [shape: bf16[32,128], index: 3, kind: input, shape index: {}]   ;;  %s856_s4 = inlined_call_operand.vmem [shape: bf16[32,128], index: 4, kind: input, shape index: {}]   ;;  %s857_s5 = inlined_call_operand.vmem [shape: bf16[32,128], index: 5, kind: input, shape index: {}]   ;;  %s858_s6 = inlined_call_operand.vmem [shape: bf16[32,128], index: 6, kind: input, shape index: {}]   ;;  %s859_s7 = inlined_call_operand.vmem [shape: bf16[32,128], index: 7, kind: input, shape index: {}]   ;;  %s860_s8 = inlined_call_operand.vmem [shape: bf16[32,128], index: 8, kind: input, shape index: {}]   ;;  %s861_s9 = inlined_call_operand.vmem [shape: bf16[32,128], index: 9, kind: output, shape index: {}]  }
   0x1 LB: > { %s700_s10 = sadd.s32 4294967295, %s747_s30   ;;  %p704_p0 = scmp.ge.s32.totalorder %s747_s30, 1  ;;  %s747_s30 = sphi %s799_s30, %s19_s30  }
   0x2   : > { %p376_p1 = scmp.lt.s32.totalorder %s747_s30, 3 }
   0x4   : > { %p377_p2 = pnand %p704_p0, %p376_p1 }
   0x5   : > { %s705_s11 = sshll.u32 (!%p377_p2), %s700_s10, 1 }
   0x6   : > { %380 = sbr.rel (%p377_p2) target bundleno = 35 (0x23), region = 56  ;;  %p453_p3 = scmp.lt.s32.totalorder (!%p377_p2), %s705_s11, 3 }
   0xb   : > { %s863_s11 = smov (!%p453_p3, %s705_s11), 3 }
   0xc   : > { %s807_s12 = sshll.u32 %s863_s11, 2 }
   0xd   : > { %s456_s15 = scalar_lea.vmem %s852_s0, %s807_s12  ;;  %s462_s18 = scalar_lea.vmem %s853_s1, %s807_s12 }
   0xe   : > { %s468_s21 = scalar_lea.vmem %s854_s2, %s807_s12  ;;  %s474_s24 = scalar_lea.vmem %s855_s3, %s807_s12  ;;  %v512_v0 = vld [vmem:[%s456_s15] sm:$0xf]  ;;  %v513_v1 = vld [vmem:[%s456_s15 + $0x4] sm:$0xf] }
   0xf   : > { %v514_v2 = vld [vmem:[%s462_s18] sm:$0xf]  ;;  %s480_s27 = scalar_lea.vmem %s856_s4, %s807_s12  ;;  %v515_v3 = vld [vmem:[%s462_s18 + $0x4] sm:$0xf]  ;;  %s486_s10 = scalar_lea.vmem %s857_s5, %s807_s12 }
  0x10   : > { %v516_v4 = vmax.bf16 %v514_v2, %v512_v0  ;;  %v518_v5 = vld [vmem:[%s468_s21] sm:$0xf]  ;;  %v519_v6 = vld [vmem:[%s468_s21 + $0x4] sm:$0xf]  ;;  %v517_v7 = vmax.bf16 %v515_v3, %v513_v1  ;;  %s492_s14 = scalar_lea.vmem %s858_s6, %s807_s12  ;;  %s498_s17 = scalar_lea.vmem %s859_s7, %s807_s12 }
  0x11   : > { %v522_v8 = vld [vmem:[%s474_s24] sm:$0xf]  ;;  %v523_v10 = vld [vmem:[%s474_s24 + $0x4] sm:$0xf]  ;;  %s504_s20 = scalar_lea.vmem %s860_s8, %s807_s12  ;;  %s510_s23 = scalar_lea.vmem %s861_s9, %s807_s12 }
  0x12   : > { %v520_v9 = vmax.bf16 %v518_v5, %v516_v4  ;;  %v521_v11 = vmax.bf16 %v519_v6, %v517_v7  ;;  %v526_v12 = vld [vmem:[%s480_s27] sm:$0xf]  ;;  %v527_v14 = vld [vmem:[%s480_s27 + $0x4] sm:$0xf] }
  0x13   : > { %v530_v16 = vld [vmem:[%s486_s10] sm:$0xf]  ;;  %v531_v18 = vld [vmem:[%s486_s10 + $0x4] sm:$0xf] }
  0x14   : > { %v524_v13 = vmax.bf16 %v522_v8, %v520_v9  ;;  %v525_v15 = vmax.bf16 %v523_v10, %v521_v11  ;;  %v534_v20 = vld [vmem:[%s492_s14] sm:$0xf]  ;;  %v535_v22 = vld [vmem:[%s492_s14 + $0x4] sm:$0xf] }
  0x15   : > { %v538_v24 = vld [vmem:[%s498_s17] sm:$0xf]  ;;  %v539_v26 = vld [vmem:[%s498_s17 + $0x4] sm:$0xf] }
  0x16   : > { %v528_v17 = vmax.bf16 %v526_v12, %v524_v13  ;;  %v529_v19 = vmax.bf16 %v527_v14, %v525_v15  ;;  %v542_v28 = vld [vmem:[%s504_s20] sm:$0xf]  ;;  %v543_v30 = vld [vmem:[%s504_s20 + $0x4] sm:$0xf] }
  0x18   : > { %v532_v21 = vmax.bf16 %v530_v16, %v528_v17  ;;  %v533_v23 = vmax.bf16 %v531_v18, %v529_v19 }
  0x1a   : > { %v536_v25 = vmax.bf16 %v534_v20, %v532_v21  ;;  %v537_v27 = vmax.bf16 %v535_v22, %v533_v23 }
  0x1c   : > { %v540_v29 = vmax.bf16 %v538_v24, %v536_v25  ;;  %v541_v31 = vmax.bf16 %v539_v26, %v537_v27 }
  0x1e   : > { %v544_v32 = vmax.bf16 %v542_v28, %v540_v29  ;;  %v545_v33 = vmax.bf16 %v543_v30, %v541_v31 }
  0x20   : > { %v732_v34 = vcombine.low %v544_v32, %v545_v33 }
  0x22   : > { %731 = vst [vmem:[%s510_s23] sm:$0xff] %v732_v34  }
  0x23 PF: > { %s19_s30 = sadd.s32 1, %s747_s30  }
  0x24   : > { %p16_p4 = scmp.ge.s32.totalorder %s19_s30, 4  }
  0x26   :  { %18 = sbr.rel (!%p16_p4) target bundleno = 1 (0x1), region = 110 }

// kernel: quantized_resnet18_forward.26
= control target key start
LH: loop header
LB: loop body
LE: loop exit
PB: predicated region body
PF: predicated region fallthrough
CT: control target
= control target key end

     0   :  { %s1637_s15 = smov 0   ;;  %s1639_s16 = smov 0   ;;  %s1910_s0 = inlined_call_operand.vmem [shape: bf16[32,1152], index: 0, kind: input, shape index: {}]   ;;  %s1911_s1 = inlined_call_operand.vmem [shape: bf16[1152,128], index: 1, kind: input, shape index: {}]   ;;  %s1912_s2 = inlined_call_operand.vmem [shape: f32[1,128], index: 2, kind: input, shape index: {}]   ;;  %s1913_s3 = inlined_call_operand.vmem [shape: f32[1,128], index: 3, kind: input, shape index: {}]   ;;  %s1914_s4 = inlined_call_operand.vmem [shape: bf16[32,128], index: 4, kind: output, shape index: {}]  }
   0x1   :  { %s1641_s17 = smov 0  }
   0x2 LB: > { %s26_s18 = sadd.s32 1, %s1604_s16  ;;  %p1258_p0 = scmp.ge.s32.totalorder %s1608_s17, 1  ;;  %s1608_s17 = sphi %s1641_s17, %s14_s17   ;;  %s1604_s16 = sphi %s1639_s16, %s1916_s16   ;;  %s1600_s15 = sphi %s1637_s15, %s1915_s15  }
   0x3   : > { %p28_p1 = scmp.ge.s32.totalorder %s26_s18, 2  ;;  %p203_p2 = scmp.lt.s32.totalorder %s1608_s17, 3 }
   0x5   : > { %s1918_s18 = smov (%p28_p1, %s26_s18), 0  ;;  %p204_p3 = pnand %p1258_p0, %p203_p2 }
   0x6   : > { %s1259_s27 = sshll.u32 (!%p204_p3), %s1600_s15, 1 }
   0x7   : > { %207 = sbr.rel (%p204_p3) target bundleno = 318 (0x13e), region = 36  ;;  %p244_p4 = scmp.lt.s32.totalorder (!%p204_p3), %s1259_s27, 3 }
   0xc   : > { %v1501_v0 = vld [vmem:[%s1911_s1 + $0x78] sm:$0xff]   ;;  %v1505_v4 = vld [vmem:[%s1911_s1 + $0x70] sm:$0xff]   ;;  %v1509_v8 = vld [vmem:[%s1911_s1 + $0x68] sm:$0xff]   ;;  %s1920_s27 = smov (!%p244_p4, %s1259_s27), 3  ;;  %vm1611_vm0 = vmmov 0  }
   0xd   : > { %v1502_v1 = vld [vmem:[%s1911_s1 + $0xf8] sm:$0xff]   ;;  %1357 = vmatprep.subr.bf16.mxu0 %v1501_v0  ;;  %v1506_v5 = vld [vmem:[%s1911_s1 + $0xf0] sm:$0xff]   ;;  %v1510_v9 = vld [vmem:[%s1911_s1 + $0xe8] sm:$0xff]   ;;  %s1474_s28 = smul.u32 36, %s1920_s27  ;;  %s1262_s20 = sshll.u32 %s1920_s27, 2 }
   0xe   : > { %v1503_v2 = vld [vmem:[%s1911_s1 + $0x38] sm:$0xff]   ;;  %1379 = vmatprep.subr.bf16.mxu1 %v1502_v1  ;;  %v1507_v6 = vld [vmem:[%s1911_s1 + $0x30] sm:$0xff]   ;;  %v1511_v10 = vld [vmem:[%s1911_s1 + $0x28] sm:$0xff]   ;;  %s267_s23 = scalar_lea.vmem %s1914_s4, %s1262_s20 }
   0xf   : > { %v1504_v3 = vld [vmem:[%s1911_s1 + $0xb8] sm:$0xff]   ;;  %1358 = vmatpush3.bf16.msra.mxu0 %v1503_v2  ;;  %v1508_v7 = vld [vmem:[%s1911_s1 + $0xb0] sm:$0xff]   ;;  %v1512_v11 = vld [vmem:[%s1911_s1 + $0xa8] sm:$0xff]   ;;  %s1754_s12 = scalar_lea.vmem %s1910_s0, %s1474_s28 }
  0x10   : > { %1380 = vmatpush3.bf16.msra.mxu1 %v1504_v3  ;;  %1359 = vmatprep.subr.bf16.mxu0 %v1505_v4  ;;  %v1513_v12 = vld [vmem:[%s1911_s1 + $0x60] sm:$0xff]   ;;  %v1517_v16 = vld [vmem:[%s1911_s1 + $0x58] sm:$0xff]   ;;  %v1521_v20 = vld [vmem:[%s1911_s1 + $0x50] sm:$0xff]  }
  0x11   : > { %1381 = vmatprep.subr.bf16.mxu1 %v1506_v5  ;;  %v1514_v13 = vld [vmem:[%s1911_s1 + $0xe0] sm:$0xff]   ;;  %v1518_v17 = vld [vmem:[%s1911_s1 + $0xd8] sm:$0xff]   ;;  %v1522_v21 = vld [vmem:[%s1911_s1 + $0xd0] sm:$0xff]  }
  0x12   : > { %v1515_v14 = vld [vmem:[%s1911_s1 + $0x20] sm:$0xff]   ;;  %v1519_v18 = vld [vmem:[%s1911_s1 + $0x18] sm:$0xff]   ;;  %v1523_v22 = vld [vmem:[%s1911_s1 + $0x10] sm:$0xff]  }
  0x13   : > { %1360 = vmatpush3.bf16.msra.mxu0 %v1507_v6  ;;  %v1516_v15 = vld [vmem:[%s1911_s1 + $0xa0] sm:$0xff]   ;;  %v1520_v19 = vld [vmem:[%s1911_s1 + $0x98] sm:$0xff]   ;;  %v1524_v23 = vld [vmem:[%s1911_s1 + $0x90] sm:$0xff]   ;;  %v1610_v6 = vmov 0.0  }
  0x14   : > { %1382 = vmatpush3.bf16.msra.mxu1 %v1508_v7  ;;  %1361 = vmatprep.subr.bf16.mxu0 %v1509_v8  ;;  %v1525_v24 = vld [vmem:[%s1911_s1 + $0x48] sm:$0xff]   ;;  %v1529_v28 = vld [vmem:[%s1911_s1 + $0x40] sm:$0xff]   ;;  %v1539_v36 = vld [vmem:[%s1911_s1 + $0x178] sm:$0xff]  }
  0x15   : > { %1383 = vmatprep.subr.bf16.mxu1 %v1510_v9  ;;  %v1526_v25 = vld [vmem:[%s1911_s1 + $0xc8] sm:$0xff]   ;;  %v1530_v29 = vld [vmem:[%s1911_s1 + $0xc0] sm:$0xff]   ;;  %v1540_v37 = vld [vmem:[%s1911_s1 + $0x138] sm:$0xff]  }
  0x16   : > { %v1527_v26 = vld [vmem:[%s1911_s1 + $0x8] sm:$0xff]   ;;  %v1531_v30 = vld [vmem:[%s1911_s1] sm:$0xff]   ;;  %v1541_v38 = vld [vmem:[%s1911_s1 + $0x1f8] sm:$0xff]  }
  0x17   : > { %1362 = vmatpush3.bf16.msra.mxu0 %v1511_v10  ;;  %v1528_v27 = vld [vmem:[%s1911_s1 + $0x88] sm:$0xff]   ;;  %v1532_v31 = vld [vmem:[%s1911_s1 + $0x80] sm:$0xff]   ;;  %v1542_v39 = vld [vmem:[%s1911_s1 + $0x1b8] sm:$0xff]  }
  0x18   : > { %1384 = vmatpush3.bf16.msra.mxu1 %v1512_v11  ;;  %1363 = vmatprep.subr.bf16.mxu0 %v1513_v12  ;;  %v1533_v32 = vld [vmem:[%s1754_s12] ss:$36 sps:$4 sm:$0xff]   ;;  %v1536_v34 = vld [vmem:[%s1754_s12 + $0x8] ss:$36 sps:$4 sm:$0xff]   ;;  %v1543_v40 = vld [vmem:[%s1911_s1 + $0x170] sm:$0xff]  }
  0x19   : > { %1385 = vmatprep.subr.bf16.mxu1 %v1514_v13  ;;  %v1535_v33 = vld [vmem:[%s1754_s12 + $0x4] ss:$36 sps:$4 sm:$0xff]   ;;  %v1538_v35 = vld [vmem:[%s1754_s12 + $0xc] ss:$36 sps:$4 sm:$0xff]   ;;  %v1555_v52 = vld [vmem:[%s1911_s1 + $0x158] sm:$0xff]  }
  0x1a   : > { %934 = vmatprep.mubr.bf16.mxu0 %v1535_v33  ;;  %975 = vmatprep.mubr.bf16.mxu1 %v1538_v35  ;;  %v1544_v41 = vld [vmem:[%s1911_s1 + $0x130] sm:$0xff]   ;;  %v1547_v44 = vld [vmem:[%s1911_s1 + $0x168] sm:$0xff]   ;;  %v1551_v48 = vld [vmem:[%s1911_s1 + $0x160] sm:$0xff]  }
  0x1b   : > { %1364 = vmatpush3.bf16.msra.mxu0 %v1515_v14  ;;  %v1545_v42 = vld [vmem:[%s1911_s1 + $0x1f0] sm:$0xff]   ;;  %v1548_v45 = vld [vmem:[%s1911_s1 + $0x128] sm:$0xff]   ;;  %v1552_v49 = vld [vmem:[%s1911_s1 + $0x120] sm:$0xff]  }
  0x1c   : > { %1386 = vmatpush3.bf16.msra.mxu1 %v1516_v15  ;;  %1365 = vmatprep.subr.bf16.mxu0 %v1517_v16  ;;  %v1546_v43 = vld [vmem:[%s1911_s1 + $0x1b0] sm:$0xff]   ;;  %v1549_v46 = vld [vmem:[%s1911_s1 + $0x1e8] sm:$0xff]   ;;  %v1553_v50 = vld [vmem:[%s1911_s1 + $0x1e0] sm:$0xff]  }
  0x1d   : > { %1387 = vmatprep.subr.bf16.mxu1 %v1518_v17  ;;  %v1550_v47 = vld [vmem:[%s1911_s1 + $0x1a8] sm:$0xff]   ;;  %v1554_v51 = vld [vmem:[%s1911_s1 + $0x1a0] sm:$0xff]   ;;  %v1556_v53 = vld [vmem:[%s1911_s1 + $0x118] sm:$0xff]  }
  0x1e   : > { %v1557_v54 = vld [vmem:[%s1911_s1 + $0x1d8] sm:$0xff]   ;;  %v1559_v56 = vld [vmem:[%s1911_s1 + $0x150] sm:$0xff]   ;;  %v1563_v60 = vld [vmem:[%s1911_s1 + $0x148] sm:$0xff]  }
  0x1f   : > { %1366 = vmatpush3.bf16.msra.mxu0 %v1519_v18  ;;  %v1558_v55 = vld [vmem:[%s1911_s1 + $0x198] sm:$0xff]   ;;  %v1560_v57 = vld [vmem:[%s1911_s1 + $0x110] sm:$0xff]   ;;  %v1564_v61 = vld [vmem:[%s1911_s1 + $0x108] sm:$0xff]  }
  0x20   : > { %1388 = vmatpush3.bf16.msra.mxu1 %v1520_v19  ;;  %1367 = vmatprep.subr.bf16.mxu0 %v1521_v20  ;;  %v1561_v58 = vld [vmem:[%s1911_s1 + $0x1d0] sm:$0xff]   ;;  %v1565_v62 = vld [vmem:[%s1911_s1 + $0x1c8] sm:$0xff]   ;;  %v1567_v0 = vld [vmem:[%s1911_s1 + $0x140] sm:$0xff]  }
  0x21   : > { %1389 = vmatprep.subr.bf16.mxu1 %v1522_v21  ;;  %v1562_v59 = vld [vmem:[%s1911_s1 + $0x190] sm:$0xff]   ;;  %v1566_v63 = vld [vmem:[%s1911_s1 + $0x188] sm:$0xff]   ;;  %v1568_v1 = vld [vmem:[%s1911_s1 + $0x100] sm:$0xff]  }
  0x22   : > { %v1569_v2 = vld [vmem:[%s1911_s1 + $0x1c0] sm:$0xff]   ;;  %v1570_v3 = vld [vmem:[%s1754_s12 + $0x10] ss:$36 sps:$4 sm:$0xff]   ;;  %v1574_v7 = vld [vmem:[%s1754_s12 + $0x18] ss:$36 sps:$4 sm:$0xff]  }
  0x23   : > { %1368 = vmatpush3.bf16.msra.mxu0 %v1523_v22  ;;  %v1572_v4 = vld [vmem:[%s1754_s12 + $0x14] ss:$36 sps:$4 sm:$0xff]   ;;  %v1573_v5 = vld [vmem:[%s1911_s1 + $0x180] sm:$0xff]   ;;  %v1579_v11 = vld [vmem:[%s1911_s1 + $0x228] sm:$0xff]  }
  0x24   : > { %1390 = vmatpush3.bf16.msra.mxu1 %v1524_v23  ;;  %1369 = vmatprep.subr.bf16.mxu0 %v1525_v24  ;;  %v1576_v8 = vld [vmem:[%s1754_s12 + $0x1c] ss:$36 sps:$4 sm:$0xff]   ;;  %v1578_v10 = vld [vmem:[%s1911_s1 + $0x230] sm:$0xff]   ;;  %v1583_v15 = vld [vmem:[%s1911_s1 + $0x208] sm:$0xff]  }
  0x25   : > { %1391 = vmatprep.subr.bf16.mxu1 %v1526_v25  ;;  %v1577_v9 = vld [vmem:[%s1911_s1 + $0x238] sm:$0xff]   ;;  %v1580_v12 = vld [vmem:[%s1911_s1 + $0x220] sm:$0xff]   ;;  %v1582_v14 = vld [vmem:[%s1911_s1 + $0x210] sm:$0xff]  }
  0x26   : > { %v1581_v13 = vld [vmem:[%s1911_s1 + $0x218] sm:$0xff]   ;;  %v1584_v16 = vld [vmem:[%s1911_s1 + $0x200] sm:$0xff]  }
  0x27   : > { %1370 = vmatpush3.bf16.msra.mxu0 %v1527_v26  ;;  %v1585_v17 = vld [vmem:[%s1754_s12 + $0x20] ss:$36 sps:$4 sm:$0xff]  }
  0x28   : > { %1392 = vmatpush3.bf16.msra.mxu1 %v1528_v27  ;;  %1371 = vmatprep.subr.bf16.mxu0 %v1529_v28 }
  0x29   : > { %1393 = vmatprep.subr.bf16.mxu1 %v1530_v29 }
  0x2b   : > { %1372 = vmatpush3.bf16.msra.mxu0 %v1531_v30 }
  0x2c   : > { %1394 = vmatpush3.bf16.msra.mxu1 %v1532_v31  ;;  %1401 = vmatprep.subr.bf16.mxu0 %v1539_v36 }
  0x2d   : > { %1423 = vmatprep.subr.bf16.mxu1 %v1541_v38 }
  0x2e   : > { %935 = vmatmul.mubr.bf16.vlgmr.msra.gmra.mxu0 %v1533_v32 }
  0x2f   : > { %976 = vmatmul.mubr.bf16.vlgmr.msra.gmra.mxu1 %v1536_v34  ;;  %1402 = vmatpush3.bf16.msra.mxu0 %v1540_v37 }
  0x30   : > { %1424 = vmatpush3.bf16.msra.mxu1 %v1542_v39  ;;  %1403 = vmatprep.subr.bf16.mxu0 %v1543_v40 }
  0x31   : > { %1425 = vmatprep.subr.bf16.mxu1 %v1545_v42  ;;  %1016 = vmatprep.mubr.bf16.mxu0 %v1572_v4 }
  0x32   : > { %1057 = vmatprep.mubr.bf16.mxu1 %v1576_v8 }
  0x33   : > { %1404 = vmatpush3.bf16.msra.mxu0 %v1544_v41 }
  0x34   : > { %1426 = vmatpush3.bf16.msra.mxu1 %v1546_v43  ;;  %1405 = vmatprep.subr.bf16.mxu0 %v1547_v44 }
  0x35   : > { %1427 = vmatprep.subr.bf16.mxu1 %v1549_v46 }
  0x37   : > { %1406 = vmatpush3.bf16.msra.mxu0 %v1548_v45 }
  0x38   : > { %1428 = vmatpush3.bf16.msra.mxu1 %v1550_v47  ;;  %1407 = vmatprep.subr.bf16.mxu0 %v1551_v48  ;;  %v1344_v48 = vld [vmem:[%s1912_s2] ss:$0 sm:$0xff] }
  0x39   : > { %1429 = vmatprep.subr.bf16.mxu1 %v1553_v50 }
  0x3b   : > { %1408 = vmatpush3.bf16.msra.mxu0 %v1552_v49 }
  0x3c   : > { %1430 = vmatpush3.bf16.msra.mxu1 %v1554_v51  ;;  %1409 = vmatprep.subr.bf16.mxu0 %v1555_v52 }
  0x3d   : > { %1431 = vmatprep.subr.bf16.mxu1 %v1557_v54 }
  0x3f   : > { %1410 = vmatpush3.bf16.msra.mxu0 %v1556_v53  ;;  %v1345_v53 = vld [vmem:[%s1913_s3] ss:$0 sm:$0xff] }
  0x40   : > { %1432 = vmatpush3.bf16.msra.mxu1 %v1558_v55  ;;  %1411 = vmatprep.subr.bf16.mxu0 %v1559_v56 }
  0x41   : > { %1433 = vmatprep.subr.bf16.mxu1 %v1561_v58 }
  0x43   : > { %1412 = vmatpush3.bf16.msra.mxu0 %v1560_v57 }
  0x44   : > { %1434 = vmatpush3.bf16.msra.mxu1 %v1562_v59  ;;  %1413 = vmatprep.subr.bf16.mxu0 %v1563_v60 }
  0x45   : > { %1435 = vmatprep.subr.bf16.mxu1 %v1565_v62 }
  0x47   : > { %1414 = vmatpush3.bf16.msra.mxu0 %v1564_v61 }
  0x48   : > { %1436 = vmatpush3.bf16.msra.mxu1 %v1566_v63  ;;  %1415 = vmatprep.subr.bf16.mxu0 %v1567_v0 }
  0x49   : > { %1437 = vmatprep.subr.bf16.mxu1 %v1569_v2 }
  0x4b   : > { %1416 = vmatpush3.bf16.msra.mxu0 %v1568_v1 }
  0x4c   : > { %1454 = vmatprep.subr.bf16.mxu0 %v1610_v6  ;;  %1438 = vmatpush3.bf16.msra.mxu1 %v1573_v5 }
  0x4e   : > { %1017 = vmatmul.mubr.bf16.vlgmr.msra.gmra.mxu0 %v1570_v3 }
  0x4f   : > { %1470 = vmatprep.mubr.msk.bf16.mxu0 %vm1611_vm0, %v1610_v6  ;;  %1455 = vmatpush3.bf16.msra.mxu0 %v1577_v9 }
  0x50   : > { %1058 = vmatmul.mubr.bf16.vlgmr.msra.gmra.mxu1 %v1574_v7  ;;  %1456 = vmatprep.subr.bf16.mxu0 %v1610_v6 }
  0x53   : > { %1457 = vmatpush3.bf16.msra.mxu0 %v1578_v10 }
  0x54   : > { %1458 = vmatprep.subr.bf16.mxu0 %v1610_v6 }
  0x57   : > { %1459 = vmatpush3.bf16.msra.mxu0 %v1579_v11 }
  0x58   : > { %1460 = vmatprep.subr.bf16.mxu0 %v1610_v6 }
  0x5b   : > { %1461 = vmatpush3.bf16.msra.mxu0 %v1580_v12 }
  0x5c   : > { %1462 = vmatprep.subr.bf16.mxu0 %v1610_v6 }
  0x5f   : > { %1463 = vmatpush3.bf16.msra.mxu0 %v1581_v13 }
  0x60   : > { %1464 = vmatprep.subr.bf16.mxu0 %v1610_v6 }
  0x63   : > { %1465 = vmatpush3.bf16.msra.mxu0 %v1582_v14 }
  0x64   : > { %1466 = vmatprep.subr.bf16.mxu0 %v1610_v6 }
  0x67   : > { %1467 = vmatpush3.bf16.msra.mxu0 %v1583_v15 }
  0x68   : > { %1468 = vmatprep.subr.bf16.mxu0 %v1610_v6 }
  0x6b   : > { %1469 = vmatpush3.bf16.msra.mxu0 %v1584_v16 }
  0x6e   : > { %1471 = vmatmul.mubr.bf16.vlgmr.msra.gmra.mxu0 %v1585_v17 }
  0xee   : > { %v1373_v18 = vpop.f32.mrf.mxu0 }
  0xef   : > { %v1395_v19 = vpop.f32.mrf.mxu1 }
  0xf0   : > { %v1374_v20 = vpop.f32.mrf.mxu0 }
  0xf1   : > { %v1396_v21 = vpop.f32.mrf.mxu1  ;;  %v1375_v31 = vadd.f32 %v1374_v20, %v1373_v18 }
  0xf2   : > { %v1376_v22 = vpop.f32.mrf.mxu0  ;;  %v1397_v32 = vadd.f32 %v1396_v21, %v1395_v19 }
  0xf3   : > { %v1398_v23 = vpop.f32.mrf.mxu1 }
  0xf4   : > { %v1377_v24 = vpop.f32.mrf.mxu0  ;;  %v978_v36 = vadd.f32 %v1397_v32, %v1375_v31 }
  0xf5   : > { %v1399_v26 = vpop.f32.mrf.mxu1  ;;  %v1378_v37 = vadd.f32 %v1377_v24, %v1376_v22 }
  0xf6   : > { %v1400_v38 = vadd.f32 %v1399_v26, %v1398_v23 }
  0xf8   : > { %v981_v43 = vadd.f32 %v1400_v38, %v1378_v37 }
 0x10e   : > { %v1417_v25 = vpop.f32.mrf.mxu0 }
 0x110   : > { %v1418_v27 = vpop.f32.mrf.mxu0  ;;  %v1439_v28 = vpop.f32.mrf.mxu1 }
 0x111   : > { %v1419_v33 = vadd.f32 %v1418_v27, %v1417_v25 }
 0x112   : > { %v1420_v29 = vpop.f32.mrf.mxu0  ;;  %v1440_v30 = vpop.f32.mrf.mxu1 }
 0x113   : > { %v1019_v39 = vadd.f32 %v1419_v33, %v978_v36  ;;  %v1441_v40 = vadd.f32 %v1440_v30, %v1439_v28 }
 0x114   : > { %v1421_v34 = vpop.f32.mrf.mxu0  ;;  %v1442_v35 = vpop.f32.mrf.mxu1 }
 0x115   : > { %v1422_v41 = vadd.f32 %v1421_v34, %v1420_v29  ;;  %v1060_v46 = vadd.f32 %v1441_v40, %v1019_v39 }
 0x116   : > { %v1443_v42 = vpop.f32.mrf.mxu1 }
 0x117   : > { %v1022_v44 = vadd.f32 %v1422_v41, %v981_v43  ;;  %v1444_v45 = vadd.f32 %v1443_v42, %v1442_v35 }
 0x119   : > { %v1063_v52 = vadd.f32 %v1444_v45, %v1022_v44 }
 0x12e   : > { %v1100_v47 = vpop.f32.mrf.mxu0 }
 0x12f   : > { %v1101_v49 = vadd.f32 %v1100_v47, %v1060_v46 }
 0x130   : > { %v1472_v50 = vpop.f32.mrf.mxu0 }
 0x131   : > { %v1114_v51 = vmul.f32 %v1344_v48, %v1101_v49 }
 0x132   : > { %v1103_v54 = vpop.f32.mrf.mxu0 }
 0x133   : > { %v1104_v55 = vadd.f32 %v1103_v54, %v1063_v52  ;;  %v1123_v57 = vadd.f32 %v1345_v53, %v1114_v51 }
 0x134   : > { %v1473_v56 = vpop.f32.mrf.mxu0 }
 0x135   : > { %v1115_v58 = vmul.f32 %v1344_v48, %v1104_v55  ;;  %v1125_v60 = vmax.f32 %v1123_v57, 0.0 }
 0x137   : > { %v1124_v59 = vadd.f32 %v1345_v53, %v1115_v58 }
 0x139   : > { %v1126_v61 = vmax.f32 %v1124_v59, 0.0 }
 0x13b   : > { %v1355_v62 = vpack.c.bf16 %v1126_v61, %v1125_v60 }
 0x13d   : > { %1356 = vst [vmem:[%s267_s23] sm:$0xff] %v1355_v62  }
 0x13e PF: > { %s14_s17 = sadd.s32 1, %s1608_s17   ;;  %s1915_s15 = smov %s1604_s16 }
 0x13f   : > { %p11_p5 = scmp.ge.s32.totalorder %s14_s17, 4   ;;  %s1916_s16 = smov %s1918_s18 }
 0x141   :  { %13 = sbr.rel (!%p11_p5) target bundleno = 2 (0x2), region = 75 }

// kernel: quantized_resnet18_forward.27
= control target key start
LH: loop header
LB: loop body
LE: loop exit
PB: predicated region body
PF: predicated region fallthrough
CT: control target
= control target key end

     0   :  { %s1729_s18 = smov 0   ;;  %s1731_s19 = smov 0   ;;  %s2005_s0 = inlined_call_operand.vmem [shape: bf16[32,1152], index: 0, kind: input, shape index: {}]   ;;  %s2006_s1 = inlined_call_operand.vmem [shape: bf16[1152,128], index: 1, kind: input, shape index: {}]   ;;  %s2007_s2 = inlined_call_operand.vmem [shape: f32[1,128], index: 2, kind: input, shape index: {}]   ;;  %s2008_s3 = inlined_call_operand.vmem [shape: f32[1,128], index: 3, kind: input, shape index: {}]   ;;  %s2009_s4 = inlined_call_operand.vmem [shape: bf16[32,128], index: 4, kind: input, shape index: {}]   ;;  %s2010_s5 = inlined_call_operand.vmem [shape: bf16[32,128], index: 5, kind: output, shape index: {}]  }
   0x1   :  { %s1733_s20 = smov 0  }
   0x2 LB: > { %s27_s21 = sadd.s32 1, %s1691_s19  ;;  %p1339_p0 = scmp.ge.s32.totalorder %s1695_s20, 1  ;;  %s1695_s20 = sphi %s1733_s20, %s15_s20   ;;  %s1691_s19 = sphi %s1731_s19, %s2012_s19   ;;  %s1687_s18 = sphi %s1729_s18, %s2011_s18  }
   0x3   : > { %p29_p1 = scmp.ge.s32.totalorder %s27_s21, 2  ;;  %p244_p2 = scmp.lt.s32.totalorder %s1695_s20, 3 }
   0x5   : > { %s2014_s21 = smov (%p29_p1, %s27_s21), 0  ;;  %p245_p3 = pnand %p1339_p0, %p244_p2 }
   0x6   : > { %s1340_s6 = sshll.u32 (!%p245_p3), %s1687_s18, 1 }
   0x7   : > { %248 = sbr.rel (%p245_p3) target bundleno = 320 (0x140), region = 40  ;;  %p295_p4 = scmp.lt.s32.totalorder (!%p245_p3), %s1340_s6, 3 }
   0xc   : > { %v1588_v0 = vld [vmem:[%s2006_s1 + $0x78] sm:$0xff]   ;;  %v1592_v4 = vld [vmem:[%s2006_s1 + $0x70] sm:$0xff]   ;;  %v1596_v8 = vld [vmem:[%s2006_s1 + $0x68] sm:$0xff]   ;;  %s2016_s6 = smov (!%p295_p4, %s1340_s6), 3  ;;  %vm1698_vm0 = vmmov 0  }
   0xd   : > { %v1589_v1 = vld [vmem:[%s2006_s1 + $0xf8] sm:$0xff]   ;;  %1444 = vmatprep.subr.bf16.mxu0 %v1588_v0  ;;  %v1593_v5 = vld [vmem:[%s2006_s1 + $0xf0] sm:$0xff]   ;;  %v1597_v9 = vld [vmem:[%s2006_s1 + $0xe8] sm:$0xff]   ;;  %s1561_s8 = smul.u32 36, %s2016_s6 }
   0xe   : > { %v1590_v2 = vld [vmem:[%s2006_s1 + $0x38] sm:$0xff]   ;;  %1466 = vmatprep.subr.bf16.mxu1 %v1589_v1  ;;  %v1594_v6 = vld [vmem:[%s2006_s1 + $0x30] sm:$0xff]   ;;  %v1598_v10 = vld [vmem:[%s2006_s1 + $0x28] sm:$0xff]  }
   0xf   : > { %v1591_v3 = vld [vmem:[%s2006_s1 + $0xb8] sm:$0xff]   ;;  %1445 = vmatpush3.bf16.msra.mxu0 %v1590_v2  ;;  %v1595_v7 = vld [vmem:[%s2006_s1 + $0xb0] sm:$0xff]   ;;  %v1599_v11 = vld [vmem:[%s2006_s1 + $0xa8] sm:$0xff]   ;;  %s1846_s22 = scalar_lea.vmem %s2005_s0, %s1561_s8 }
  0x10   : > { %1467 = vmatpush3.bf16.msra.mxu1 %v1591_v3  ;;  %1446 = vmatprep.subr.bf16.mxu0 %v1592_v4  ;;  %v1600_v12 = vld [vmem:[%s2006_s1 + $0x60] sm:$0xff]   ;;  %v1604_v16 = vld [vmem:[%s2006_s1 + $0x58] sm:$0xff]   ;;  %v1608_v20 = vld [vmem:[%s2006_s1 + $0x50] sm:$0xff]  }
  0x11   : > { %1468 = vmatprep.subr.bf16.mxu1 %v1593_v5  ;;  %v1601_v13 = vld [vmem:[%s2006_s1 + $0xe0] sm:$0xff]   ;;  %v1605_v17 = vld [vmem:[%s2006_s1 + $0xd8] sm:$0xff]   ;;  %v1609_v21 = vld [vmem:[%s2006_s1 + $0xd0] sm:$0xff]  }
  0x12   : > { %v1602_v14 = vld [vmem:[%s2006_s1 + $0x20] sm:$0xff]   ;;  %v1606_v18 = vld [vmem:[%s2006_s1 + $0x18] sm:$0xff]   ;;  %v1610_v22 = vld [vmem:[%s2006_s1 + $0x10] sm:$0xff]  }
  0x13   : > { %1447 = vmatpush3.bf16.msra.mxu0 %v1594_v6  ;;  %v1603_v15 = vld [vmem:[%s2006_s1 + $0xa0] sm:$0xff]   ;;  %v1607_v19 = vld [vmem:[%s2006_s1 + $0x98] sm:$0xff]   ;;  %v1611_v23 = vld [vmem:[%s2006_s1 + $0x90] sm:$0xff]   ;;  %v1697_v6 = vmov 0.0  }
  0x14   : > { %1469 = vmatpush3.bf16.msra.mxu1 %v1595_v7  ;;  %1448 = vmatprep.subr.bf16.mxu0 %v1596_v8  ;;  %v1612_v24 = vld [vmem:[%s2006_s1 + $0x48] sm:$0xff]   ;;  %v1616_v28 = vld [vmem:[%s2006_s1 + $0x40] sm:$0xff]   ;;  %v1626_v36 = vld [vmem:[%s2006_s1 + $0x178] sm:$0xff]  }
  0x15   : > { %1470 = vmatprep.subr.bf16.mxu1 %v1597_v9  ;;  %v1613_v25 = vld [vmem:[%s2006_s1 + $0xc8] sm:$0xff]   ;;  %v1617_v29 = vld [vmem:[%s2006_s1 + $0xc0] sm:$0xff]   ;;  %v1627_v37 = vld [vmem:[%s2006_s1 + $0x138] sm:$0xff]  }
  0x16   : > { %v1614_v26 = vld [vmem:[%s2006_s1 + $0x8] sm:$0xff]   ;;  %v1618_v30 = vld [vmem:[%s2006_s1] sm:$0xff]   ;;  %v1628_v38 = vld [vmem:[%s2006_s1 + $0x1f8] sm:$0xff]  }
  0x17   : > { %1449 = vmatpush3.bf16.msra.mxu0 %v1598_v10  ;;  %v1615_v27 = vld [vmem:[%s2006_s1 + $0x88] sm:$0xff]   ;;  %v1619_v31 = vld [vmem:[%s2006_s1 + $0x80] sm:$0xff]   ;;  %v1629_v39 = vld [vmem:[%s2006_s1 + $0x1b8] sm:$0xff]  }
  0x18   : > { %1471 = vmatpush3.bf16.msra.mxu1 %v1599_v11  ;;  %1450 = vmatprep.subr.bf16.mxu0 %v1600_v12  ;;  %v1620_v32 = vld [vmem:[%s1846_s22] ss:$36 sps:$4 sm:$0xff]   ;;  %v1623_v34 = vld [vmem:[%s1846_s22 + $0x8] ss:$36 sps:$4 sm:$0xff]   ;;  %v1630_v40 = vld [vmem:[%s2006_s1 + $0x170] sm:$0xff]  }
  0x19   : > { %1472 = vmatprep.subr.bf16.mxu1 %v1601_v13  ;;  %v1622_v33 = vld [vmem:[%s1846_s22 + $0x4] ss:$36 sps:$4 sm:$0xff]   ;;  %v1625_v35 = vld [vmem:[%s1846_s22 + $0xc] ss:$36 sps:$4 sm:$0xff]   ;;  %v1642_v52 = vld [vmem:[%s2006_s1 + $0x158] sm:$0xff]  }
  0x1a   : > { %994 = vmatprep.mubr.bf16.mxu0 %v1622_v33  ;;  %1035 = vmatprep.mubr.bf16.mxu1 %v1625_v35  ;;  %v1631_v41 = vld [vmem:[%s2006_s1 + $0x130] sm:$0xff]   ;;  %v1634_v44 = vld [vmem:[%s2006_s1 + $0x168] sm:$0xff]   ;;  %v1638_v48 = vld [vmem:[%s2006_s1 + $0x160] sm:$0xff]  }
  0x1b   : > { %1451 = vmatpush3.bf16.msra.mxu0 %v1602_v14  ;;  %v1632_v42 = vld [vmem:[%s2006_s1 + $0x1f0] sm:$0xff]   ;;  %v1635_v45 = vld [vmem:[%s2006_s1 + $0x128] sm:$0xff]   ;;  %v1639_v49 = vld [vmem:[%s2006_s1 + $0x120] sm:$0xff]  }
  0x1c   : > { %1473 = vmatpush3.bf16.msra.mxu1 %v1603_v15  ;;  %1452 = vmatprep.subr.bf16.mxu0 %v1604_v16  ;;  %v1633_v43 = vld [vmem:[%s2006_s1 + $0x1b0] sm:$0xff]   ;;  %v1636_v46 = vld [vmem:[%s2006_s1 + $0x1e8] sm:$0xff]   ;;  %v1640_v50 = vld [vmem:[%s2006_s1 + $0x1e0] sm:$0xff]  }
  0x1d   : > { %1474 = vmatprep.subr.bf16.mxu1 %v1605_v17  ;;  %v1637_v47 = vld [vmem:[%s2006_s1 + $0x1a8] sm:$0xff]   ;;  %v1641_v51 = vld [vmem:[%s2006_s1 + $0x1a0] sm:$0xff]   ;;  %v1643_v53 = vld [vmem:[%s2006_s1 + $0x118] sm:$0xff]  }
  0x1e   : > { %v1644_v54 = vld [vmem:[%s2006_s1 + $0x1d8] sm:$0xff]   ;;  %v1646_v56 = vld [vmem:[%s2006_s1 + $0x150] sm:$0xff]   ;;  %v1650_v60 = vld [vmem:[%s2006_s1 + $0x148] sm:$0xff]  }
  0x1f   : > { %1453 = vmatpush3.bf16.msra.mxu0 %v1606_v18  ;;  %v1645_v55 = vld [vmem:[%s2006_s1 + $0x198] sm:$0xff]   ;;  %v1647_v57 = vld [vmem:[%s2006_s1 + $0x110] sm:$0xff]   ;;  %v1651_v61 = vld [vmem:[%s2006_s1 + $0x108] sm:$0xff]  }
  0x20   : > { %1475 = vmatpush3.bf16.msra.mxu1 %v1607_v19  ;;  %1454 = vmatprep.subr.bf16.mxu0 %v1608_v20  ;;  %v1648_v58 = vld [vmem:[%s2006_s1 + $0x1d0] sm:$0xff]   ;;  %v1652_v62 = vld [vmem:[%s2006_s1 + $0x1c8] sm:$0xff]   ;;  %v1654_v0 = vld [vmem:[%s2006_s1 + $0x140] sm:$0xff]  }
  0x21   : > { %1476 = vmatprep.subr.bf16.mxu1 %v1609_v21  ;;  %v1649_v59 = vld [vmem:[%s2006_s1 + $0x190] sm:$0xff]   ;;  %v1653_v63 = vld [vmem:[%s2006_s1 + $0x188] sm:$0xff]   ;;  %v1655_v1 = vld [vmem:[%s2006_s1 + $0x100] sm:$0xff]  }
  0x22   : > { %v1656_v2 = vld [vmem:[%s2006_s1 + $0x1c0] sm:$0xff]   ;;  %v1657_v3 = vld [vmem:[%s1846_s22 + $0x10] ss:$36 sps:$4 sm:$0xff]   ;;  %v1661_v7 = vld [vmem:[%s1846_s22 + $0x18] ss:$36 sps:$4 sm:$0xff]  }
  0x23   : > { %1455 = vmatpush3.bf16.msra.mxu0 %v1610_v22  ;;  %v1659_v4 = vld [vmem:[%s1846_s22 + $0x14] ss:$36 sps:$4 sm:$0xff]   ;;  %v1660_v5 = vld [vmem:[%s2006_s1 + $0x180] sm:$0xff]   ;;  %v1666_v11 = vld [vmem:[%s2006_s1 + $0x228] sm:$0xff]  }
  0x24   : > { %1477 = vmatpush3.bf16.msra.mxu1 %v1611_v23  ;;  %1456 = vmatprep.subr.bf16.mxu0 %v1612_v24  ;;  %v1663_v8 = vld [vmem:[%s1846_s22 + $0x1c] ss:$36 sps:$4 sm:$0xff]   ;;  %v1665_v10 = vld [vmem:[%s2006_s1 + $0x230] sm:$0xff]   ;;  %v1670_v15 = vld [vmem:[%s2006_s1 + $0x208] sm:$0xff]  }
  0x25   : > { %1478 = vmatprep.subr.bf16.mxu1 %v1613_v25  ;;  %v1664_v9 = vld [vmem:[%s2006_s1 + $0x238] sm:$0xff]   ;;  %v1667_v12 = vld [vmem:[%s2006_s1 + $0x220] sm:$0xff]   ;;  %v1669_v14 = vld [vmem:[%s2006_s1 + $0x210] sm:$0xff]  }
  0x26   : > { %v1668_v13 = vld [vmem:[%s2006_s1 + $0x218] sm:$0xff]   ;;  %v1671_v16 = vld [vmem:[%s2006_s1 + $0x200] sm:$0xff]  }
  0x27   : > { %1457 = vmatpush3.bf16.msra.mxu0 %v1614_v26  ;;  %v1672_v17 = vld [vmem:[%s1846_s22 + $0x20] ss:$36 sps:$4 sm:$0xff]   ;;  %s1343_s22 = sshll.u32 %s2016_s6, 2 }
  0x28   : > { %1479 = vmatpush3.bf16.msra.mxu1 %v1615_v27  ;;  %1458 = vmatprep.subr.bf16.mxu0 %v1616_v28  ;;  %s318_s29 = scalar_lea.vmem %s2009_s4, %s1343_s22  ;;  %s327_s11 = scalar_lea.vmem %s2010_s5, %s1343_s22 }
  0x29   : > { %1480 = vmatprep.subr.bf16.mxu1 %v1617_v29 }
  0x2b   : > { %1459 = vmatpush3.bf16.msra.mxu0 %v1618_v30 }
  0x2c   : > { %1481 = vmatpush3.bf16.msra.mxu1 %v1619_v31  ;;  %1488 = vmatprep.subr.bf16.mxu0 %v1626_v36 }
  0x2d   : > { %1510 = vmatprep.subr.bf16.mxu1 %v1628_v38 }
  0x2e   : > { %995 = vmatmul.mubr.bf16.vlgmr.msra.gmra.mxu0 %v1620_v32 }
  0x2f   : > { %1036 = vmatmul.mubr.bf16.vlgmr.msra.gmra.mxu1 %v1623_v34  ;;  %1489 = vmatpush3.bf16.msra.mxu0 %v1627_v37 }
  0x30   : > { %1511 = vmatpush3.bf16.msra.mxu1 %v1629_v39  ;;  %1490 = vmatprep.subr.bf16.mxu0 %v1630_v40 }
  0x31   : > { %1512 = vmatprep.subr.bf16.mxu1 %v1632_v42  ;;  %1076 = vmatprep.mubr.bf16.mxu0 %v1659_v4 }
  0x32   : > { %1117 = vmatprep.mubr.bf16.mxu1 %v1663_v8 }
  0x33   : > { %1491 = vmatpush3.bf16.msra.mxu0 %v1631_v41 }
  0x34   : > { %1513 = vmatpush3.bf16.msra.mxu1 %v1633_v43  ;;  %1492 = vmatprep.subr.bf16.mxu0 %v1634_v44 }
  0x35   : > { %1514 = vmatprep.subr.bf16.mxu1 %v1636_v46 }
  0x37   : > { %1493 = vmatpush3.bf16.msra.mxu0 %v1635_v45 }
  0x38   : > { %1515 = vmatpush3.bf16.msra.mxu1 %v1637_v47  ;;  %1494 = vmatprep.subr.bf16.mxu0 %v1638_v48  ;;  %v1427_v48 = vld [vmem:[%s2007_s2] ss:$0 sm:$0xff] }
  0x39   : > { %1516 = vmatprep.subr.bf16.mxu1 %v1640_v50  ;;  %v1428_v50 = vld [vmem:[%s2008_s3] ss:$0 sm:$0xff] }
  0x3b   : > { %1495 = vmatpush3.bf16.msra.mxu0 %v1639_v49 }
  0x3c   : > { %1517 = vmatpush3.bf16.msra.mxu1 %v1641_v51  ;;  %1496 = vmatprep.subr.bf16.mxu0 %v1642_v52  ;;  %v1436_v51 = vld [vmem:[%s318_s29] sm:$0xff]  }
  0x3d   : > { %1518 = vmatprep.subr.bf16.mxu1 %v1644_v54 }
  0x3f   : > { %1497 = vmatpush3.bf16.msra.mxu0 %v1643_v53 }
  0x40   : > { %1519 = vmatpush3.bf16.msra.mxu1 %v1645_v55  ;;  %1498 = vmatprep.subr.bf16.mxu0 %v1646_v56 }
  0x41   : > { %1520 = vmatprep.subr.bf16.mxu1 %v1648_v58 }
  0x43   : > { %1499 = vmatpush3.bf16.msra.mxu0 %v1647_v57  ;;  %v1437_v57 = vunpack.c.l.bf16 %v1436_v51 }
  0x44   : > { %1521 = vmatpush3.bf16.msra.mxu1 %v1649_v59  ;;  %1500 = vmatprep.subr.bf16.mxu0 %v1650_v60 }
  0x45   : > { %1522 = vmatprep.subr.bf16.mxu1 %v1652_v62 }
  0x47   : > { %1501 = vmatpush3.bf16.msra.mxu0 %v1651_v61  ;;  %v1438_v61 = vunpack.c.h.bf16 %v1436_v51 }
  0x48   : > { %1523 = vmatpush3.bf16.msra.mxu1 %v1653_v63  ;;  %1502 = vmatprep.subr.bf16.mxu0 %v1654_v0 }
  0x49   : > { %1524 = vmatprep.subr.bf16.mxu1 %v1656_v2 }
  0x4b   : > { %1503 = vmatpush3.bf16.msra.mxu0 %v1655_v1 }
  0x4c   : > { %1541 = vmatprep.subr.bf16.mxu0 %v1697_v6  ;;  %1525 = vmatpush3.bf16.msra.mxu1 %v1660_v5 }
  0x4e   : > { %1077 = vmatmul.mubr.bf16.vlgmr.msra.gmra.mxu0 %v1657_v3 }
  0x4f   : > { %1557 = vmatprep.mubr.msk.bf16.mxu0 %vm1698_vm0, %v1697_v6  ;;  %1542 = vmatpush3.bf16.msra.mxu0 %v1664_v9 }
  0x50   : > { %1118 = vmatmul.mubr.bf16.vlgmr.msra.gmra.mxu1 %v1661_v7  ;;  %1543 = vmatprep.subr.bf16.mxu0 %v1697_v6 }
  0x53   : > { %1544 = vmatpush3.bf16.msra.mxu0 %v1665_v10 }
  0x54   : > { %1545 = vmatprep.subr.bf16.mxu0 %v1697_v6 }
  0x57   : > { %1546 = vmatpush3.bf16.msra.mxu0 %v1666_v11 }
  0x58   : > { %1547 = vmatprep.subr.bf16.mxu0 %v1697_v6 }
  0x5b   : > { %1548 = vmatpush3.bf16.msra.mxu0 %v1667_v12 }
  0x5c   : > { %1549 = vmatprep.subr.bf16.mxu0 %v1697_v6 }
  0x5f   : > { %1550 = vmatpush3.bf16.msra.mxu0 %v1668_v13 }
  0x60   : > { %1551 = vmatprep.subr.bf16.mxu0 %v1697_v6 }
  0x63   : > { %1552 = vmatpush3.bf16.msra.mxu0 %v1669_v14 }
  0x64   : > { %1553 = vmatprep.subr.bf16.mxu0 %v1697_v6 }
  0x67   : > { %1554 = vmatpush3.bf16.msra.mxu0 %v1670_v15 }
  0x68   : > { %1555 = vmatprep.subr.bf16.mxu0 %v1697_v6 }
  0x6b   : > { %1556 = vmatpush3.bf16.msra.mxu0 %v1671_v16 }
  0x6e   : > { %1558 = vmatmul.mubr.bf16.vlgmr.msra.gmra.mxu0 %v1672_v17 }
  0xee   : > { %v1460_v18 = vpop.f32.mrf.mxu0 }
  0xef   : > { %v1482_v19 = vpop.f32.mrf.mxu1 }
  0xf0   : > { %v1461_v20 = vpop.f32.mrf.mxu0 }
  0xf1   : > { %v1483_v21 = vpop.f32.mrf.mxu1  ;;  %v1462_v31 = vadd.f32 %v1461_v20, %v1460_v18 }
  0xf2   : > { %v1463_v22 = vpop.f32.mrf.mxu0  ;;  %v1484_v32 = vadd.f32 %v1483_v21, %v1482_v19 }
  0xf3   : > { %v1485_v23 = vpop.f32.mrf.mxu1 }
  0xf4   : > { %v1464_v24 = vpop.f32.mrf.mxu0  ;;  %v1038_v36 = vadd.f32 %v1484_v32, %v1462_v31 }
  0xf5   : > { %v1486_v26 = vpop.f32.mrf.mxu1  ;;  %v1465_v37 = vadd.f32 %v1464_v24, %v1463_v22 }
  0xf6   : > { %v1487_v38 = vadd.f32 %v1486_v26, %v1485_v23 }
  0xf8   : > { %v1041_v43 = vadd.f32 %v1487_v38, %v1465_v37 }
 0x10e   : > { %v1504_v25 = vpop.f32.mrf.mxu0 }
 0x110   : > { %v1505_v27 = vpop.f32.mrf.mxu0  ;;  %v1526_v28 = vpop.f32.mrf.mxu1 }
 0x111   : > { %v1506_v33 = vadd.f32 %v1505_v27, %v1504_v25 }
 0x112   : > { %v1507_v29 = vpop.f32.mrf.mxu0  ;;  %v1527_v30 = vpop.f32.mrf.mxu1 }
 0x113   : > { %v1079_v39 = vadd.f32 %v1506_v33, %v1038_v36  ;;  %v1528_v40 = vadd.f32 %v1527_v30, %v1526_v28 }
 0x114   : > { %v1508_v34 = vpop.f32.mrf.mxu0  ;;  %v1529_v35 = vpop.f32.mrf.mxu1 }
 0x115   : > { %v1509_v41 = vadd.f32 %v1508_v34, %v1507_v29  ;;  %v1120_v46 = vadd.f32 %v1528_v40, %v1079_v39 }
 0x116   : > { %v1530_v42 = vpop.f32.mrf.mxu1 }
 0x117   : > { %v1082_v44 = vadd.f32 %v1509_v41, %v1041_v43  ;;  %v1531_v45 = vadd.f32 %v1530_v42, %v1529_v35 }
 0x119   : > { %v1123_v54 = vadd.f32 %v1531_v45, %v1082_v44 }
 0x12e   : > { %v1160_v47 = vpop.f32.mrf.mxu0 }
 0x12f   : > { %v1161_v49 = vadd.f32 %v1160_v47, %v1120_v46 }
 0x130   : > { %v1559_v52 = vpop.f32.mrf.mxu0 }
 0x131   : > { %v1174_v53 = vmul.f32 %v1427_v48, %v1161_v49 }
 0x132   : > { %v1163_v55 = vpop.f32.mrf.mxu0 }
 0x133   : > { %v1183_v56 = vadd.f32 %v1428_v50, %v1174_v53  ;;  %v1164_v58 = vadd.f32 %v1163_v55, %v1123_v54 }
 0x134   : > { %v1560_v59 = vpop.f32.mrf.mxu0 }
 0x135   : > { %v1175_v60 = vmul.f32 %v1427_v48, %v1164_v58  ;;  %v1189_v62 = vadd.f32 %v1437_v57, %v1183_v56 }
 0x137   : > { %v1184_v63 = vadd.f32 %v1428_v50, %v1175_v60  ;;  %v1191_v1 = vmax.f32 %v1189_v62, 0.0 }
 0x139   : > { %v1190_v0 = vadd.f32 %v1438_v61, %v1184_v63 }
 0x13b   : > { %v1192_v2 = vmax.f32 %v1190_v0, 0.0 }
 0x13d   : > { %v1442_v3 = vpack.c.bf16 %v1192_v2, %v1191_v1 }
 0x13f   : > { %1443 = vst [vmem:[%s327_s11] sm:$0xff] %v1442_v3  }
 0x140 PF: > { %s15_s20 = sadd.s32 1, %s1695_s20   ;;  %s2011_s18 = smov %s1691_s19 }
 0x141   : > { %p12_p5 = scmp.ge.s32.totalorder %s15_s20, 4   ;;  %s2012_s19 = smov %s2014_s21 }
 0x143   :  { %14 = sbr.rel (!%p12_p5) target bundleno = 2 (0x2), region = 82 }

// kernel: quantized_resnet18_forward.31
= control target key start
LH: loop header
LB: loop body
LE: loop exit
PB: predicated region body
PF: predicated region fallthrough
CT: control target
= control target key end

     0   :  { %v223_v0 = vmov 0.0   ;;  %vm224_vm0 = vmmov 0   ;;  %s286_s1 = inlined_call_operand.vmem [shape: bf16[128,128], index: 1, kind: input, shape index: {}]   ;;  %s287_s0 = inlined_call_operand.vmem [shape: bf16[16,128], index: 0, kind: input, shape index: {}]   ;;  %s288_s2 = inlined_call_operand.vmem [shape: f32[1,128], index: 2, kind: input, shape index: {}]   ;;  %s289_s3 = inlined_call_operand.vmem [shape: f32[1,128], index: 3, kind: input, shape index: {}]   ;;  %s290_s4 = inlined_call_operand.vmem [shape: bf16[16,128], index: 4, kind: output, shape index: {}]  }
   0x1   :  { %192 = vmatprep.subr.bf16.mxu0 %v223_v0  ;;  %v214_v1 = vld [vmem:[%s286_s1 + $0x38] sm:$0xff]   ;;  %208 = vmatprep.mubr.msk.bf16.mxu0 %vm224_vm0, %v223_v0  ;;  %v215_v2 = vld [vmem:[%s286_s1 + $0x30] sm:$0xff]   ;;  %v216_v3 = vld [vmem:[%s286_s1 + $0x28] sm:$0xff]  }
   0x2   :  { %193 = vmatpush3.bf16.msra.mxu0 %v214_v1  ;;  %v217_v4 = vld [vmem:[%s286_s1 + $0x20] sm:$0xff]   ;;  %v218_v5 = vld [vmem:[%s286_s1 + $0x18] sm:$0xff]   ;;  %v219_v6 = vld [vmem:[%s286_s1 + $0x10] sm:$0xff]  }
   0x3   :  { %194 = vmatprep.subr.bf16.mxu0 %v223_v0  ;;  %v220_v7 = vld [vmem:[%s286_s1 + $0x8] sm:$0xff]   ;;  %v221_v8 = vld [vmem:[%s286_s1] sm:$0xff]  }
   0x4   :  { %v222_v9 = vld [vmem:[%s287_s0] sm:$0xff]  }
   0x5   :  { %v172_v11 = vld [vmem:[%s288_s2] ss:$0 sm:$0xff] }
   0x6   :  { %195 = vmatpush3.bf16.msra.mxu0 %v215_v2  ;;  %v173_v14 = vld [vmem:[%s289_s3] ss:$0 sm:$0xff] }
   0x7   :  { %196 = vmatprep.subr.bf16.mxu0 %v223_v0 }
   0xa   :  { %197 = vmatpush3.bf16.msra.mxu0 %v216_v3 }
   0xb   :  { %198 = vmatprep.subr.bf16.mxu0 %v223_v0 }
   0xe   :  { %199 = vmatpush3.bf16.msra.mxu0 %v217_v4 }
   0xf   :  { %200 = vmatprep.subr.bf16.mxu0 %v223_v0 }
  0x12   :  { %201 = vmatpush3.bf16.msra.mxu0 %v218_v5 }
  0x13   :  { %202 = vmatprep.subr.bf16.mxu0 %v223_v0 }
  0x16   :  { %203 = vmatpush3.bf16.msra.mxu0 %v219_v6 }
  0x17   :  { %204 = vmatprep.subr.bf16.mxu0 %v223_v0 }
  0x1a   :  { %205 = vmatpush3.bf16.msra.mxu0 %v220_v7 }
  0x1b   :  { %206 = vmatprep.subr.bf16.mxu0 %v223_v0 }
  0x1e   :  { %207 = vmatpush3.bf16.msra.mxu0 %v221_v8 }
  0x21   :  { %209 = vmatmul.mubr.bf16.vlgmr.msra.gmra.mxu0 %v222_v9 }
  0xe1   :  { %v124_v10 = vpop.f32.mrf.mxu0 }
  0xe2   :  { %v138_v13 = vmul.f32 %v172_v11, %v124_v10 }
  0xe3   :  { %v210_v12 = vpop.f32.mrf.mxu0 }
  0xe4   :  { %v147_v18 = vadd.f32 %v173_v14, %v138_v13 }
  0xe5   :  { %v127_v15 = vpop.f32.mrf.mxu0 }
  0xe6   :  { %v139_v16 = vmul.f32 %v172_v11, %v127_v15 }
  0xe7   :  { %v211_v17 = vpop.f32.mrf.mxu0 }
  0xe8   :  { %v148_v19 = vadd.f32 %v173_v14, %v139_v16 }
  0xea   :  { %v181_v20 = vpack.c.bf16 %v148_v19, %v147_v18 }
  0xec   :  { %182 = vst [vmem:[%s290_s4] sm:$0xff] %v181_v20  }

// kernel: quantized_resnet18_forward.30
= control target key start
LH: loop header
LB: loop body
LE: loop exit
PB: predicated region body
PF: predicated region fallthrough
CT: control target
= control target key end

     0   :  { %vm1186_vm0 = vmmov 0   ;;  %s1464_s1 = inlined_call_operand.vmem [shape: bf16[1152,128], index: 1, kind: input, shape index: {}]   ;;  %s1465_s0 = inlined_call_operand.vmem [shape: bf16[16,1152], index: 0, kind: input, shape index: {}]   ;;  %s1466_s2 = inlined_call_operand.vmem [shape: f32[1,128], index: 2, kind: input, shape index: {}]   ;;  %s1467_s3 = inlined_call_operand.vmem [shape: f32[1,128], index: 3, kind: input, shape index: {}]   ;;  %s1468_s4 = inlined_call_operand.vmem [shape: bf16[16,128], index: 4, kind: output, shape index: {}]  }
   0x1   :  { %v1100_v0 = vld [vmem:[%s1464_s1 + $0x78] sm:$0xff]   ;;  %v1104_v4 = vld [vmem:[%s1464_s1 + $0x70] sm:$0xff]   ;;  %v1108_v8 = vld [vmem:[%s1464_s1 + $0x68] sm:$0xff]  }
   0x2   :  { %v1101_v1 = vld [vmem:[%s1464_s1 + $0xf8] sm:$0xff]   ;;  %981 = vmatprep.subr.bf16.mxu0 %v1100_v0  ;;  %v1105_v5 = vld [vmem:[%s1464_s1 + $0xf0] sm:$0xff]   ;;  %v1109_v9 = vld [vmem:[%s1464_s1 + $0xe8] sm:$0xff]  }
   0x3   :  { %v1102_v2 = vld [vmem:[%s1464_s1 + $0x38] sm:$0xff]   ;;  %1003 = vmatprep.subr.bf16.mxu1 %v1101_v1  ;;  %v1106_v6 = vld [vmem:[%s1464_s1 + $0x30] sm:$0xff]   ;;  %v1110_v10 = vld [vmem:[%s1464_s1 + $0x28] sm:$0xff]  }
   0x4   :  { %v1103_v3 = vld [vmem:[%s1464_s1 + $0xb8] sm:$0xff]   ;;  %982 = vmatpush3.bf16.msra.mxu0 %v1102_v2  ;;  %v1107_v7 = vld [vmem:[%s1464_s1 + $0xb0] sm:$0xff]   ;;  %v1111_v11 = vld [vmem:[%s1464_s1 + $0xa8] sm:$0xff]  }
   0x5   :  { %1004 = vmatpush3.bf16.msra.mxu1 %v1103_v3  ;;  %983 = vmatprep.subr.bf16.mxu0 %v1104_v4  ;;  %v1112_v12 = vld [vmem:[%s1464_s1 + $0x60] sm:$0xff]   ;;  %v1116_v16 = vld [vmem:[%s1464_s1 + $0x58] sm:$0xff]   ;;  %v1120_v20 = vld [vmem:[%s1464_s1 + $0x50] sm:$0xff]  }
   0x6   :  { %1005 = vmatprep.subr.bf16.mxu1 %v1105_v5  ;;  %v1113_v13 = vld [vmem:[%s1464_s1 + $0xe0] sm:$0xff]   ;;  %v1117_v17 = vld [vmem:[%s1464_s1 + $0xd8] sm:$0xff]   ;;  %v1121_v21 = vld [vmem:[%s1464_s1 + $0xd0] sm:$0xff]  }
   0x7   :  { %v1114_v14 = vld [vmem:[%s1464_s1 + $0x20] sm:$0xff]   ;;  %v1118_v18 = vld [vmem:[%s1464_s1 + $0x18] sm:$0xff]   ;;  %v1122_v22 = vld [vmem:[%s1464_s1 + $0x10] sm:$0xff]  }
   0x8   :  { %984 = vmatpush3.bf16.msra.mxu0 %v1106_v6  ;;  %v1115_v15 = vld [vmem:[%s1464_s1 + $0xa0] sm:$0xff]   ;;  %v1119_v19 = vld [vmem:[%s1464_s1 + $0x98] sm:$0xff]   ;;  %v1123_v23 = vld [vmem:[%s1464_s1 + $0x90] sm:$0xff]   ;;  %v1185_v6 = vmov 0.0  }
   0x9   :  { %1006 = vmatpush3.bf16.msra.mxu1 %v1107_v7  ;;  %985 = vmatprep.subr.bf16.mxu0 %v1108_v8  ;;  %v1124_v24 = vld [vmem:[%s1464_s1 + $0x48] sm:$0xff]   ;;  %v1128_v28 = vld [vmem:[%s1464_s1 + $0x40] sm:$0xff]   ;;  %v1138_v36 = vld [vmem:[%s1464_s1 + $0x178] sm:$0xff]  }
   0xa   :  { %1007 = vmatprep.subr.bf16.mxu1 %v1109_v9  ;;  %v1125_v25 = vld [vmem:[%s1464_s1 + $0xc8] sm:$0xff]   ;;  %v1129_v29 = vld [vmem:[%s1464_s1 + $0xc0] sm:$0xff]   ;;  %v1139_v37 = vld [vmem:[%s1464_s1 + $0x138] sm:$0xff]  }
   0xb   :  { %v1126_v26 = vld [vmem:[%s1464_s1 + $0x8] sm:$0xff]   ;;  %v1130_v30 = vld [vmem:[%s1464_s1] sm:$0xff]   ;;  %v1140_v38 = vld [vmem:[%s1464_s1 + $0x1f8] sm:$0xff]  }
   0xc   :  { %986 = vmatpush3.bf16.msra.mxu0 %v1110_v10  ;;  %v1127_v27 = vld [vmem:[%s1464_s1 + $0x88] sm:$0xff]   ;;  %v1131_v31 = vld [vmem:[%s1464_s1 + $0x80] sm:$0xff]   ;;  %v1141_v39 = vld [vmem:[%s1464_s1 + $0x1b8] sm:$0xff]  }
   0xd   :  { %1008 = vmatpush3.bf16.msra.mxu1 %v1111_v11  ;;  %987 = vmatprep.subr.bf16.mxu0 %v1112_v12  ;;  %v1132_v32 = vld [vmem:[%s1465_s0] ss:$36 sps:$4 sm:$0xff]   ;;  %v1135_v34 = vld [vmem:[%s1465_s0 + $0x8] ss:$36 sps:$4 sm:$0xff]   ;;  %v1142_v40 = vld [vmem:[%s1464_s1 + $0x170] sm:$0xff]  }
   0xe   :  { %1009 = vmatprep.subr.bf16.mxu1 %v1113_v13  ;;  %v1134_v33 = vld [vmem:[%s1465_s0 + $0x4] ss:$36 sps:$4 sm:$0xff]   ;;  %v1137_v35 = vld [vmem:[%s1465_s0 + $0xc] ss:$36 sps:$4 sm:$0xff]   ;;  %v1154_v52 = vld [vmem:[%s1464_s1 + $0x158] sm:$0xff]  }
   0xf   :  { %682 = vmatprep.mubr.bf16.mxu0 %v1134_v33  ;;  %723 = vmatprep.mubr.bf16.mxu1 %v1137_v35  ;;  %v1143_v41 = vld [vmem:[%s1464_s1 + $0x130] sm:$0xff]   ;;  %v1146_v44 = vld [vmem:[%s1464_s1 + $0x168] sm:$0xff]   ;;  %v1150_v48 = vld [vmem:[%s1464_s1 + $0x160] sm:$0xff]  }
  0x10   :  { %988 = vmatpush3.bf16.msra.mxu0 %v1114_v14  ;;  %v1144_v42 = vld [vmem:[%s1464_s1 + $0x1f0] sm:$0xff]   ;;  %v1147_v45 = vld [vmem:[%s1464_s1 + $0x128] sm:$0xff]   ;;  %v1151_v49 = vld [vmem:[%s1464_s1 + $0x120] sm:$0xff]  }
  0x11   :  { %1010 = vmatpush3.bf16.msra.mxu1 %v1115_v15  ;;  %989 = vmatprep.subr.bf16.mxu0 %v1116_v16  ;;  %v1145_v43 = vld [vmem:[%s1464_s1 + $0x1b0] sm:$0xff]   ;;  %v1148_v46 = vld [vmem:[%s1464_s1 + $0x1e8] sm:$0xff]   ;;  %v1152_v50 = vld [vmem:[%s1464_s1 + $0x1e0] sm:$0xff]  }
  0x12   :  { %1011 = vmatprep.subr.bf16.mxu1 %v1117_v17  ;;  %v1149_v47 = vld [vmem:[%s1464_s1 + $0x1a8] sm:$0xff]   ;;  %v1153_v51 = vld [vmem:[%s1464_s1 + $0x1a0] sm:$0xff]   ;;  %v1155_v53 = vld [vmem:[%s1464_s1 + $0x118] sm:$0xff]  }
  0x13   :  { %v1156_v54 = vld [vmem:[%s1464_s1 + $0x1d8] sm:$0xff]   ;;  %v1158_v56 = vld [vmem:[%s1464_s1 + $0x150] sm:$0xff]   ;;  %v1162_v60 = vld [vmem:[%s1464_s1 + $0x148] sm:$0xff]  }
  0x14   :  { %990 = vmatpush3.bf16.msra.mxu0 %v1118_v18  ;;  %v1157_v55 = vld [vmem:[%s1464_s1 + $0x198] sm:$0xff]   ;;  %v1159_v57 = vld [vmem:[%s1464_s1 + $0x110] sm:$0xff]   ;;  %v1163_v61 = vld [vmem:[%s1464_s1 + $0x108] sm:$0xff]  }
  0x15   :  { %1012 = vmatpush3.bf16.msra.mxu1 %v1119_v19  ;;  %991 = vmatprep.subr.bf16.mxu0 %v1120_v20  ;;  %v1160_v58 = vld [vmem:[%s1464_s1 + $0x1d0] sm:$0xff]   ;;  %v1164_v62 = vld [vmem:[%s1464_s1 + $0x1c8] sm:$0xff]   ;;  %v1166_v0 = vld [vmem:[%s1464_s1 + $0x140] sm:$0xff]  }
  0x16   :  { %1013 = vmatprep.subr.bf16.mxu1 %v1121_v21  ;;  %v1161_v59 = vld [vmem:[%s1464_s1 + $0x190] sm:$0xff]   ;;  %v1165_v63 = vld [vmem:[%s1464_s1 + $0x188] sm:$0xff]   ;;  %v1167_v1 = vld [vmem:[%s1464_s1 + $0x100] sm:$0xff]  }
  0x17   :  { %v1168_v2 = vld [vmem:[%s1464_s1 + $0x1c0] sm:$0xff]   ;;  %v1169_v3 = vld [vmem:[%s1465_s0 + $0x10] ss:$36 sps:$4 sm:$0xff]   ;;  %v1173_v7 = vld [vmem:[%s1465_s0 + $0x18] ss:$36 sps:$4 sm:$0xff]  }
  0x18   :  { %992 = vmatpush3.bf16.msra.mxu0 %v1122_v22  ;;  %v1171_v4 = vld [vmem:[%s1465_s0 + $0x14] ss:$36 sps:$4 sm:$0xff]   ;;  %v1172_v5 = vld [vmem:[%s1464_s1 + $0x180] sm:$0xff]   ;;  %v1178_v11 = vld [vmem:[%s1464_s1 + $0x228] sm:$0xff]  }
  0x19   :  { %1014 = vmatpush3.bf16.msra.mxu1 %v1123_v23  ;;  %993 = vmatprep.subr.bf16.mxu0 %v1124_v24  ;;  %v1175_v8 = vld [vmem:[%s1465_s0 + $0x1c] ss:$36 sps:$4 sm:$0xff]   ;;  %v1177_v10 = vld [vmem:[%s1464_s1 + $0x230] sm:$0xff]   ;;  %v1182_v15 = vld [vmem:[%s1464_s1 + $0x208] sm:$0xff]  }
  0x1a   :  { %1015 = vmatprep.subr.bf16.mxu1 %v1125_v25  ;;  %v1176_v9 = vld [vmem:[%s1464_s1 + $0x238] sm:$0xff]   ;;  %v1179_v12 = vld [vmem:[%s1464_s1 + $0x220] sm:$0xff]   ;;  %v1181_v14 = vld [vmem:[%s1464_s1 + $0x210] sm:$0xff]  }
  0x1b   :  { %v1180_v13 = vld [vmem:[%s1464_s1 + $0x218] sm:$0xff]   ;;  %v1183_v16 = vld [vmem:[%s1464_s1 + $0x200] sm:$0xff]  }
  0x1c   :  { %994 = vmatpush3.bf16.msra.mxu0 %v1126_v26  ;;  %v1184_v17 = vld [vmem:[%s1465_s0 + $0x20] ss:$36 sps:$4 sm:$0xff]  }
  0x1d   :  { %1016 = vmatpush3.bf16.msra.mxu1 %v1127_v27  ;;  %995 = vmatprep.subr.bf16.mxu0 %v1128_v28 }
  0x1e   :  { %1017 = vmatprep.subr.bf16.mxu1 %v1129_v29 }
  0x20   :  { %996 = vmatpush3.bf16.msra.mxu0 %v1130_v30 }
  0x21   :  { %1018 = vmatpush3.bf16.msra.mxu1 %v1131_v31  ;;  %1025 = vmatprep.subr.bf16.mxu0 %v1138_v36 }
  0x22   :  { %1047 = vmatprep.subr.bf16.mxu1 %v1140_v38 }
  0x23   :  { %683 = vmatmul.mubr.bf16.vlgmr.msra.gmra.mxu0 %v1132_v32 }
  0x24   :  { %724 = vmatmul.mubr.bf16.vlgmr.msra.gmra.mxu1 %v1135_v34  ;;  %1026 = vmatpush3.bf16.msra.mxu0 %v1139_v37 }
  0x25   :  { %1048 = vmatpush3.bf16.msra.mxu1 %v1141_v39  ;;  %1027 = vmatprep.subr.bf16.mxu0 %v1142_v40 }
  0x26   :  { %1049 = vmatprep.subr.bf16.mxu1 %v1144_v42  ;;  %764 = vmatprep.mubr.bf16.mxu0 %v1171_v4 }
  0x27   :  { %805 = vmatprep.mubr.bf16.mxu1 %v1175_v8 }
  0x28   :  { %1028 = vmatpush3.bf16.msra.mxu0 %v1143_v41 }
  0x29   :  { %1050 = vmatpush3.bf16.msra.mxu1 %v1145_v43  ;;  %1029 = vmatprep.subr.bf16.mxu0 %v1146_v44 }
  0x2a   :  { %1051 = vmatprep.subr.bf16.mxu1 %v1148_v46 }
  0x2c   :  { %1030 = vmatpush3.bf16.msra.mxu0 %v1147_v45 }
  0x2d   :  { %1052 = vmatpush3.bf16.msra.mxu1 %v1149_v47  ;;  %1031 = vmatprep.subr.bf16.mxu0 %v1150_v48  ;;  %v970_v48 = vld [vmem:[%s1466_s2] ss:$0 sm:$0xff] }
  0x2e   :  { %1053 = vmatprep.subr.bf16.mxu1 %v1152_v50 }
  0x30   :  { %1032 = vmatpush3.bf16.msra.mxu0 %v1151_v49 }
  0x31   :  { %1054 = vmatpush3.bf16.msra.mxu1 %v1153_v51  ;;  %1033 = vmatprep.subr.bf16.mxu0 %v1154_v52 }
  0x32   :  { %1055 = vmatprep.subr.bf16.mxu1 %v1156_v54 }
  0x34   :  { %1034 = vmatpush3.bf16.msra.mxu0 %v1155_v53  ;;  %v971_v53 = vld [vmem:[%s1467_s3] ss:$0 sm:$0xff] }
  0x35   :  { %1056 = vmatpush3.bf16.msra.mxu1 %v1157_v55  ;;  %1035 = vmatprep.subr.bf16.mxu0 %v1158_v56 }
  0x36   :  { %1057 = vmatprep.subr.bf16.mxu1 %v1160_v58 }
  0x38   :  { %1036 = vmatpush3.bf16.msra.mxu0 %v1159_v57 }
  0x39   :  { %1058 = vmatpush3.bf16.msra.mxu1 %v1161_v59  ;;  %1037 = vmatprep.subr.bf16.mxu0 %v1162_v60 }
  0x3a   :  { %1059 = vmatprep.subr.bf16.mxu1 %v1164_v62 }
  0x3c   :  { %1038 = vmatpush3.bf16.msra.mxu0 %v1163_v61 }
  0x3d   :  { %1060 = vmatpush3.bf16.msra.mxu1 %v1165_v63  ;;  %1039 = vmatprep.subr.bf16.mxu0 %v1166_v0 }
  0x3e   :  { %1061 = vmatprep.subr.bf16.mxu1 %v1168_v2 }
  0x40   :  { %1040 = vmatpush3.bf16.msra.mxu0 %v1167_v1 }
  0x41   :  { %1078 = vmatprep.subr.bf16.mxu0 %v1185_v6  ;;  %1062 = vmatpush3.bf16.msra.mxu1 %v1172_v5 }
  0x43   :  { %765 = vmatmul.mubr.bf16.vlgmr.msra.gmra.mxu0 %v1169_v3 }
  0x44   :  { %1094 = vmatprep.mubr.msk.bf16.mxu0 %vm1186_vm0, %v1185_v6  ;;  %1079 = vmatpush3.bf16.msra.mxu0 %v1176_v9 }
  0x45   :  { %806 = vmatmul.mubr.bf16.vlgmr.msra.gmra.mxu1 %v1173_v7  ;;  %1080 = vmatprep.subr.bf16.mxu0 %v1185_v6 }
  0x48   :  { %1081 = vmatpush3.bf16.msra.mxu0 %v1177_v10 }
  0x49   :  { %1082 = vmatprep.subr.bf16.mxu0 %v1185_v6 }
  0x4c   :  { %1083 = vmatpush3.bf16.msra.mxu0 %v1178_v11 }
  0x4d   :  { %1084 = vmatprep.subr.bf16.mxu0 %v1185_v6 }
  0x50   :  { %1085 = vmatpush3.bf16.msra.mxu0 %v1179_v12 }
  0x51   :  { %1086 = vmatprep.subr.bf16.mxu0 %v1185_v6 }
  0x54   :  { %1087 = vmatpush3.bf16.msra.mxu0 %v1180_v13 }
  0x55   :  { %1088 = vmatprep.subr.bf16.mxu0 %v1185_v6 }
  0x58   :  { %1089 = vmatpush3.bf16.msra.mxu0 %v1181_v14 }
  0x59   :  { %1090 = vmatprep.subr.bf16.mxu0 %v1185_v6 }
  0x5c   :  { %1091 = vmatpush3.bf16.msra.mxu0 %v1182_v15 }
  0x5d   :  { %1092 = vmatprep.subr.bf16.mxu0 %v1185_v6 }
  0x60   :  { %1093 = vmatpush3.bf16.msra.mxu0 %v1183_v16 }
  0x63   :  { %1095 = vmatmul.mubr.bf16.vlgmr.msra.gmra.mxu0 %v1184_v17 }
  0xe3   :  { %v997_v18 = vpop.f32.mrf.mxu0 }
  0xe4   :  { %v1019_v19 = vpop.f32.mrf.mxu1 }
  0xe5   :  { %v998_v20 = vpop.f32.mrf.mxu0 }
  0xe6   :  { %v1020_v21 = vpop.f32.mrf.mxu1  ;;  %v999_v31 = vadd.f32 %v998_v20, %v997_v18 }
  0xe7   :  { %v1000_v22 = vpop.f32.mrf.mxu0  ;;  %v1021_v32 = vadd.f32 %v1020_v21, %v1019_v19 }
  0xe8   :  { %v1022_v23 = vpop.f32.mrf.mxu1 }
  0xe9   :  { %v1001_v24 = vpop.f32.mrf.mxu0  ;;  %v726_v36 = vadd.f32 %v1021_v32, %v999_v31 }
  0xea   :  { %v1023_v26 = vpop.f32.mrf.mxu1  ;;  %v1002_v37 = vadd.f32 %v1001_v24, %v1000_v22 }
  0xeb   :  { %v1024_v38 = vadd.f32 %v1023_v26, %v1022_v23 }
  0xed   :  { %v729_v43 = vadd.f32 %v1024_v38, %v1002_v37 }
 0x103   :  { %v1041_v25 = vpop.f32.mrf.mxu0 }
 0x105   :  { %v1042_v27 = vpop.f32.mrf.mxu0  ;;  %v1063_v28 = vpop.f32.mrf.mxu1 }
 0x106   :  { %v1043_v33 = vadd.f32 %v1042_v27, %v1041_v25 }
 0x107   :  { %v1044_v29 = vpop.f32.mrf.mxu0  ;;  %v1064_v30 = vpop.f32.mrf.mxu1 }
 0x108   :  { %v767_v39 = vadd.f32 %v1043_v33, %v726_v36  ;;  %v1065_v40 = vadd.f32 %v1064_v30, %v1063_v28 }
 0x109   :  { %v1045_v34 = vpop.f32.mrf.mxu0  ;;  %v1066_v35 = vpop.f32.mrf.mxu1 }
 0x10a   :  { %v1046_v41 = vadd.f32 %v1045_v34, %v1044_v29  ;;  %v808_v46 = vadd.f32 %v1065_v40, %v767_v39 }
 0x10b   :  { %v1067_v42 = vpop.f32.mrf.mxu1 }
 0x10c   :  { %v770_v44 = vadd.f32 %v1046_v41, %v729_v43  ;;  %v1068_v45 = vadd.f32 %v1067_v42, %v1066_v35 }
 0x10e   :  { %v811_v52 = vadd.f32 %v1068_v45, %v770_v44 }
 0x123   :  { %v848_v47 = vpop.f32.mrf.mxu0 }
 0x124   :  { %v849_v49 = vadd.f32 %v848_v47, %v808_v46 }
 0x125   :  { %v1096_v50 = vpop.f32.mrf.mxu0 }
 0x126   :  { %v862_v51 = vmul.f32 %v970_v48, %v849_v49 }
 0x127   :  { %v851_v54 = vpop.f32.mrf.mxu0 }
 0x128   :  { %v852_v55 = vadd.f32 %v851_v54, %v811_v52  ;;  %v871_v57 = vadd.f32 %v971_v53, %v862_v51 }
 0x129   :  { %v1097_v56 = vpop.f32.mrf.mxu0 }
 0x12a   :  { %v863_v58 = vmul.f32 %v970_v48, %v852_v55  ;;  %v873_v60 = vmax.f32 %v871_v57, 0.0 }
 0x12c   :  { %v872_v59 = vadd.f32 %v971_v53, %v863_v58 }
 0x12e   :  { %v874_v61 = vmax.f32 %v872_v59, 0.0 }
 0x130   :  { %v979_v62 = vpack.c.bf16 %v874_v61, %v873_v60 }
 0x132   :  { %980 = vst [vmem:[%s1468_s4] sm:$0xff] %v979_v62  }

// kernel: quantized_resnet18_forward.45
= control target key start
LH: loop header
LB: loop body
LE: loop exit
PB: predicated region body
PF: predicated region fallthrough
CT: control target
= control target key end

     0   :  { %v206_v0 = vmov 0.0   ;;  %vm207_vm0 = vmmov 0   ;;  %s272_s1 = inlined_call_operand.vmem [shape: bf16[128,128], index: 1, kind: input, shape index: {}]   ;;  %s273_s0 = inlined_call_operand.vmem [shape: bf16[16,128], index: 0, kind: input, shape index: {}]   ;;  %s274_s2 = inlined_call_operand.vmem [shape: f32[1,128], index: 2, kind: input, shape index: {}]   ;;  %s275_s3 = inlined_call_operand.vmem [shape: f32[1,128], index: 3, kind: input, shape index: {}]   ;;  %s276_s4 = inlined_call_operand.vmem [shape: f32[16,128], index: 4, kind: output, shape index: {}]  }
   0x1   :  { %175 = vmatprep.subr.bf16.mxu0 %v206_v0  ;;  %v197_v1 = vld [vmem:[%s272_s1 + $0x38] sm:$0xff]   ;;  %191 = vmatprep.mubr.msk.bf16.mxu0 %vm207_vm0, %v206_v0  ;;  %v198_v2 = vld [vmem:[%s272_s1 + $0x30] sm:$0xff]   ;;  %v199_v3 = vld [vmem:[%s272_s1 + $0x28] sm:$0xff]  }
   0x2   :  { %176 = vmatpush3.bf16.msra.mxu0 %v197_v1  ;;  %v200_v4 = vld [vmem:[%s272_s1 + $0x20] sm:$0xff]   ;;  %v201_v5 = vld [vmem:[%s272_s1 + $0x18] sm:$0xff]   ;;  %v202_v6 = vld [vmem:[%s272_s1 + $0x10] sm:$0xff]  }
   0x3   :  { %177 = vmatprep.subr.bf16.mxu0 %v206_v0  ;;  %v203_v7 = vld [vmem:[%s272_s1 + $0x8] sm:$0xff]   ;;  %v204_v8 = vld [vmem:[%s272_s1] sm:$0xff]  }
   0x4   :  { %v205_v9 = vld [vmem:[%s273_s0] sm:$0xff]  }
   0x5   :  { %v164_v10 = vld [vmem:[%s274_s2] ss:$0 sm:$0xff] }
   0x6   :  { %178 = vmatpush3.bf16.msra.mxu0 %v198_v2  ;;  %v165_v12 = vld [vmem:[%s275_s3] ss:$0 sm:$0xff] }
   0x7   :  { %179 = vmatprep.subr.bf16.mxu0 %v206_v0 }
   0xa   :  { %180 = vmatpush3.bf16.msra.mxu0 %v199_v3 }
   0xb   :  { %181 = vmatprep.subr.bf16.mxu0 %v206_v0 }
   0xe   :  { %182 = vmatpush3.bf16.msra.mxu0 %v200_v4 }
   0xf   :  { %183 = vmatprep.subr.bf16.mxu0 %v206_v0 }
  0x12   :  { %184 = vmatpush3.bf16.msra.mxu0 %v201_v5 }
  0x13   :  { %185 = vmatprep.subr.bf16.mxu0 %v206_v0 }
  0x16   :  { %186 = vmatpush3.bf16.msra.mxu0 %v202_v6 }
  0x17   :  { %187 = vmatprep.subr.bf16.mxu0 %v206_v0 }
  0x1a   :  { %188 = vmatpush3.bf16.msra.mxu0 %v203_v7 }
  0x1b   :  { %189 = vmatprep.subr.bf16.mxu0 %v206_v0 }
  0x1e   :  { %190 = vmatpush3.bf16.msra.mxu0 %v204_v8 }
  0x21   :  { %192 = vmatmul.mubr.bf16.vlgmr.msra.gmra.mxu0 %v205_v9 }
  0xe1   :  { %v124_v11 = vpop.f32.mrf.mxu0 }
  0xe2   :  { %v138_v13 = vmul.f32 %v164_v10, %v124_v11 }
  0xe3   :  { %v193_v14 = vpop.f32.mrf.mxu0 }
  0xe4   :  { %v147_v15 = vadd.f32 %v165_v12, %v138_v13 }
  0xe5   :  { %v127_v16 = vpop.f32.mrf.mxu0 }
  0xe6   :  { %149 = vst [vmem:[%s276_s4] sm:$0xff] %v147_v15  ;;  %v139_v17 = vmul.f32 %v164_v10, %v127_v16 }
  0xe7   :  { %v194_v18 = vpop.f32.mrf.mxu0 }
  0xe8   :  { %v148_v19 = vadd.f32 %v165_v12, %v139_v17 }
  0xea   :  { %150 = vst [vmem:[%s276_s4 + $0x8] sm:$0xff] %v148_v19 }

// kernel: quantized_resnet18_forward.32
= control target key start
LH: loop header
LB: loop body
LE: loop exit
PB: predicated region body
PF: predicated region fallthrough
CT: control target
= control target key end

     0   :  { %vm1199_vm0 = vmmov 0   ;;  %s1485_s1 = inlined_call_operand.vmem [shape: bf16[1152,128], index: 1, kind: input, shape index: {}]   ;;  %s1486_s0 = inlined_call_operand.vmem [shape: bf16[16,1152], index: 0, kind: input, shape index: {}]   ;;  %s1487_s2 = inlined_call_operand.vmem [shape: f32[1,128], index: 2, kind: input, shape index: {}]   ;;  %s1488_s3 = inlined_call_operand.vmem [shape: f32[1,128], index: 3, kind: input, shape index: {}]   ;;  %s1489_s4 = inlined_call_operand.vmem [shape: bf16[16,128], index: 4, kind: input, shape index: {}]   ;;  %s1490_s5 = inlined_call_operand.vmem [shape: bf16[16,128], index: 5, kind: output, shape index: {}]  }
   0x1   :  { %v1113_v0 = vld [vmem:[%s1485_s1 + $0x78] sm:$0xff]   ;;  %v1117_v4 = vld [vmem:[%s1485_s1 + $0x70] sm:$0xff]   ;;  %v1121_v8 = vld [vmem:[%s1485_s1 + $0x68] sm:$0xff]  }
   0x2   :  { %v1114_v1 = vld [vmem:[%s1485_s1 + $0xf8] sm:$0xff]   ;;  %994 = vmatprep.subr.bf16.mxu0 %v1113_v0  ;;  %v1118_v5 = vld [vmem:[%s1485_s1 + $0xf0] sm:$0xff]   ;;  %v1122_v9 = vld [vmem:[%s1485_s1 + $0xe8] sm:$0xff]  }
   0x3   :  { %v1115_v2 = vld [vmem:[%s1485_s1 + $0x38] sm:$0xff]   ;;  %1016 = vmatprep.subr.bf16.mxu1 %v1114_v1  ;;  %v1119_v6 = vld [vmem:[%s1485_s1 + $0x30] sm:$0xff]   ;;  %v1123_v10 = vld [vmem:[%s1485_s1 + $0x28] sm:$0xff]  }
   0x4   :  { %v1116_v3 = vld [vmem:[%s1485_s1 + $0xb8] sm:$0xff]   ;;  %995 = vmatpush3.bf16.msra.mxu0 %v1115_v2  ;;  %v1120_v7 = vld [vmem:[%s1485_s1 + $0xb0] sm:$0xff]   ;;  %v1124_v11 = vld [vmem:[%s1485_s1 + $0xa8] sm:$0xff]  }
   0x5   :  { %1017 = vmatpush3.bf16.msra.mxu1 %v1116_v3  ;;  %996 = vmatprep.subr.bf16.mxu0 %v1117_v4  ;;  %v1125_v12 = vld [vmem:[%s1485_s1 + $0x60] sm:$0xff]   ;;  %v1129_v16 = vld [vmem:[%s1485_s1 + $0x58] sm:$0xff]   ;;  %v1133_v20 = vld [vmem:[%s1485_s1 + $0x50] sm:$0xff]  }
   0x6   :  { %1018 = vmatprep.subr.bf16.mxu1 %v1118_v5  ;;  %v1126_v13 = vld [vmem:[%s1485_s1 + $0xe0] sm:$0xff]   ;;  %v1130_v17 = vld [vmem:[%s1485_s1 + $0xd8] sm:$0xff]   ;;  %v1134_v21 = vld [vmem:[%s1485_s1 + $0xd0] sm:$0xff]  }
   0x7   :  { %v1127_v14 = vld [vmem:[%s1485_s1 + $0x20] sm:$0xff]   ;;  %v1131_v18 = vld [vmem:[%s1485_s1 + $0x18] sm:$0xff]   ;;  %v1135_v22 = vld [vmem:[%s1485_s1 + $0x10] sm:$0xff]  }
   0x8   :  { %997 = vmatpush3.bf16.msra.mxu0 %v1119_v6  ;;  %v1128_v15 = vld [vmem:[%s1485_s1 + $0xa0] sm:$0xff]   ;;  %v1132_v19 = vld [vmem:[%s1485_s1 + $0x98] sm:$0xff]   ;;  %v1136_v23 = vld [vmem:[%s1485_s1 + $0x90] sm:$0xff]   ;;  %v1198_v6 = vmov 0.0  }
   0x9   :  { %1019 = vmatpush3.bf16.msra.mxu1 %v1120_v7  ;;  %998 = vmatprep.subr.bf16.mxu0 %v1121_v8  ;;  %v1137_v24 = vld [vmem:[%s1485_s1 + $0x48] sm:$0xff]   ;;  %v1141_v28 = vld [vmem:[%s1485_s1 + $0x40] sm:$0xff]   ;;  %v1151_v36 = vld [vmem:[%s1485_s1 + $0x178] sm:$0xff]  }
   0xa   :  { %1020 = vmatprep.subr.bf16.mxu1 %v1122_v9  ;;  %v1138_v25 = vld [vmem:[%s1485_s1 + $0xc8] sm:$0xff]   ;;  %v1142_v29 = vld [vmem:[%s1485_s1 + $0xc0] sm:$0xff]   ;;  %v1152_v37 = vld [vmem:[%s1485_s1 + $0x138] sm:$0xff]  }
   0xb   :  { %v1139_v26 = vld [vmem:[%s1485_s1 + $0x8] sm:$0xff]   ;;  %v1143_v30 = vld [vmem:[%s1485_s1] sm:$0xff]   ;;  %v1153_v38 = vld [vmem:[%s1485_s1 + $0x1f8] sm:$0xff]  }
   0xc   :  { %999 = vmatpush3.bf16.msra.mxu0 %v1123_v10  ;;  %v1140_v27 = vld [vmem:[%s1485_s1 + $0x88] sm:$0xff]   ;;  %v1144_v31 = vld [vmem:[%s1485_s1 + $0x80] sm:$0xff]   ;;  %v1154_v39 = vld [vmem:[%s1485_s1 + $0x1b8] sm:$0xff]  }
   0xd   :  { %1021 = vmatpush3.bf16.msra.mxu1 %v1124_v11  ;;  %1000 = vmatprep.subr.bf16.mxu0 %v1125_v12  ;;  %v1145_v32 = vld [vmem:[%s1486_s0] ss:$36 sps:$4 sm:$0xff]   ;;  %v1148_v34 = vld [vmem:[%s1486_s0 + $0x8] ss:$36 sps:$4 sm:$0xff]   ;;  %v1155_v40 = vld [vmem:[%s1485_s1 + $0x170] sm:$0xff]  }
   0xe   :  { %1022 = vmatprep.subr.bf16.mxu1 %v1126_v13  ;;  %v1147_v33 = vld [vmem:[%s1486_s0 + $0x4] ss:$36 sps:$4 sm:$0xff]   ;;  %v1150_v35 = vld [vmem:[%s1486_s0 + $0xc] ss:$36 sps:$4 sm:$0xff]   ;;  %v1167_v52 = vld [vmem:[%s1485_s1 + $0x158] sm:$0xff]  }
   0xf   :  { %685 = vmatprep.mubr.bf16.mxu0 %v1147_v33  ;;  %726 = vmatprep.mubr.bf16.mxu1 %v1150_v35  ;;  %v1156_v41 = vld [vmem:[%s1485_s1 + $0x130] sm:$0xff]   ;;  %v1159_v44 = vld [vmem:[%s1485_s1 + $0x168] sm:$0xff]   ;;  %v1163_v48 = vld [vmem:[%s1485_s1 + $0x160] sm:$0xff]  }
  0x10   :  { %1001 = vmatpush3.bf16.msra.mxu0 %v1127_v14  ;;  %v1157_v42 = vld [vmem:[%s1485_s1 + $0x1f0] sm:$0xff]   ;;  %v1160_v45 = vld [vmem:[%s1485_s1 + $0x128] sm:$0xff]   ;;  %v1164_v49 = vld [vmem:[%s1485_s1 + $0x120] sm:$0xff]  }
  0x11   :  { %1023 = vmatpush3.bf16.msra.mxu1 %v1128_v15  ;;  %1002 = vmatprep.subr.bf16.mxu0 %v1129_v16  ;;  %v1158_v43 = vld [vmem:[%s1485_s1 + $0x1b0] sm:$0xff]   ;;  %v1161_v46 = vld [vmem:[%s1485_s1 + $0x1e8] sm:$0xff]   ;;  %v1165_v50 = vld [vmem:[%s1485_s1 + $0x1e0] sm:$0xff]  }
  0x12   :  { %1024 = vmatprep.subr.bf16.mxu1 %v1130_v17  ;;  %v1162_v47 = vld [vmem:[%s1485_s1 + $0x1a8] sm:$0xff]   ;;  %v1166_v51 = vld [vmem:[%s1485_s1 + $0x1a0] sm:$0xff]   ;;  %v1168_v53 = vld [vmem:[%s1485_s1 + $0x118] sm:$0xff]  }
  0x13   :  { %v1169_v54 = vld [vmem:[%s1485_s1 + $0x1d8] sm:$0xff]   ;;  %v1171_v56 = vld [vmem:[%s1485_s1 + $0x150] sm:$0xff]   ;;  %v1175_v60 = vld [vmem:[%s1485_s1 + $0x148] sm:$0xff]  }
  0x14   :  { %1003 = vmatpush3.bf16.msra.mxu0 %v1131_v18  ;;  %v1170_v55 = vld [vmem:[%s1485_s1 + $0x198] sm:$0xff]   ;;  %v1172_v57 = vld [vmem:[%s1485_s1 + $0x110] sm:$0xff]   ;;  %v1176_v61 = vld [vmem:[%s1485_s1 + $0x108] sm:$0xff]  }
  0x15   :  { %1025 = vmatpush3.bf16.msra.mxu1 %v1132_v19  ;;  %1004 = vmatprep.subr.bf16.mxu0 %v1133_v20  ;;  %v1173_v58 = vld [vmem:[%s1485_s1 + $0x1d0] sm:$0xff]   ;;  %v1177_v62 = vld [vmem:[%s1485_s1 + $0x1c8] sm:$0xff]   ;;  %v1179_v0 = vld [vmem:[%s1485_s1 + $0x140] sm:$0xff]  }
  0x16   :  { %1026 = vmatprep.subr.bf16.mxu1 %v1134_v21  ;;  %v1174_v59 = vld [vmem:[%s1485_s1 + $0x190] sm:$0xff]   ;;  %v1178_v63 = vld [vmem:[%s1485_s1 + $0x188] sm:$0xff]   ;;  %v1180_v1 = vld [vmem:[%s1485_s1 + $0x100] sm:$0xff]  }
  0x17   :  { %v1181_v2 = vld [vmem:[%s1485_s1 + $0x1c0] sm:$0xff]   ;;  %v1182_v3 = vld [vmem:[%s1486_s0 + $0x10] ss:$36 sps:$4 sm:$0xff]   ;;  %v1186_v7 = vld [vmem:[%s1486_s0 + $0x18] ss:$36 sps:$4 sm:$0xff]  }
  0x18   :  { %1005 = vmatpush3.bf16.msra.mxu0 %v1135_v22  ;;  %v1184_v4 = vld [vmem:[%s1486_s0 + $0x14] ss:$36 sps:$4 sm:$0xff]   ;;  %v1185_v5 = vld [vmem:[%s1485_s1 + $0x180] sm:$0xff]   ;;  %v1191_v11 = vld [vmem:[%s1485_s1 + $0x228] sm:$0xff]  }
  0x19   :  { %1027 = vmatpush3.bf16.msra.mxu1 %v1136_v23  ;;  %1006 = vmatprep.subr.bf16.mxu0 %v1137_v24  ;;  %v1188_v8 = vld [vmem:[%s1486_s0 + $0x1c] ss:$36 sps:$4 sm:$0xff]   ;;  %v1190_v10 = vld [vmem:[%s1485_s1 + $0x230] sm:$0xff]   ;;  %v1195_v15 = vld [vmem:[%s1485_s1 + $0x208] sm:$0xff]  }
  0x1a   :  { %1028 = vmatprep.subr.bf16.mxu1 %v1138_v25  ;;  %v1189_v9 = vld [vmem:[%s1485_s1 + $0x238] sm:$0xff]   ;;  %v1192_v12 = vld [vmem:[%s1485_s1 + $0x220] sm:$0xff]   ;;  %v1194_v14 = vld [vmem:[%s1485_s1 + $0x210] sm:$0xff]  }
  0x1b   :  { %v1193_v13 = vld [vmem:[%s1485_s1 + $0x218] sm:$0xff]   ;;  %v1196_v16 = vld [vmem:[%s1485_s1 + $0x200] sm:$0xff]  }
  0x1c   :  { %1007 = vmatpush3.bf16.msra.mxu0 %v1139_v26  ;;  %v1197_v17 = vld [vmem:[%s1486_s0 + $0x20] ss:$36 sps:$4 sm:$0xff]  }
  0x1d   :  { %1029 = vmatpush3.bf16.msra.mxu1 %v1140_v27  ;;  %1008 = vmatprep.subr.bf16.mxu0 %v1141_v28 }
  0x1e   :  { %1030 = vmatprep.subr.bf16.mxu1 %v1142_v29 }
  0x20   :  { %1009 = vmatpush3.bf16.msra.mxu0 %v1143_v30 }
  0x21   :  { %1031 = vmatpush3.bf16.msra.mxu1 %v1144_v31  ;;  %1038 = vmatprep.subr.bf16.mxu0 %v1151_v36 }
  0x22   :  { %1060 = vmatprep.subr.bf16.mxu1 %v1153_v38 }
  0x23   :  { %686 = vmatmul.mubr.bf16.vlgmr.msra.gmra.mxu0 %v1145_v32 }
  0x24   :  { %727 = vmatmul.mubr.bf16.vlgmr.msra.gmra.mxu1 %v1148_v34  ;;  %1039 = vmatpush3.bf16.msra.mxu0 %v1152_v37 }
  0x25   :  { %1061 = vmatpush3.bf16.msra.mxu1 %v1154_v39  ;;  %1040 = vmatprep.subr.bf16.mxu0 %v1155_v40 }
  0x26   :  { %1062 = vmatprep.subr.bf16.mxu1 %v1157_v42  ;;  %767 = vmatprep.mubr.bf16.mxu0 %v1184_v4 }
  0x27   :  { %808 = vmatprep.mubr.bf16.mxu1 %v1188_v8 }
  0x28   :  { %1041 = vmatpush3.bf16.msra.mxu0 %v1156_v41 }
  0x29   :  { %1063 = vmatpush3.bf16.msra.mxu1 %v1158_v43  ;;  %1042 = vmatprep.subr.bf16.mxu0 %v1159_v44 }
  0x2a   :  { %1064 = vmatprep.subr.bf16.mxu1 %v1161_v46 }
  0x2c   :  { %1043 = vmatpush3.bf16.msra.mxu0 %v1160_v45 }
  0x2d   :  { %1065 = vmatpush3.bf16.msra.mxu1 %v1162_v47  ;;  %1044 = vmatprep.subr.bf16.mxu0 %v1163_v48  ;;  %v979_v48 = vld [vmem:[%s1487_s2] ss:$0 sm:$0xff] }
  0x2e   :  { %1066 = vmatprep.subr.bf16.mxu1 %v1165_v50  ;;  %v980_v50 = vld [vmem:[%s1488_s3] ss:$0 sm:$0xff] }
  0x30   :  { %1045 = vmatpush3.bf16.msra.mxu0 %v1164_v49 }
  0x31   :  { %1067 = vmatpush3.bf16.msra.mxu1 %v1166_v51  ;;  %1046 = vmatprep.subr.bf16.mxu0 %v1167_v52  ;;  %v986_v51 = vld [vmem:[%s1489_s4] sm:$0xff]  }
  0x32   :  { %1068 = vmatprep.subr.bf16.mxu1 %v1169_v54 }
  0x34   :  { %1047 = vmatpush3.bf16.msra.mxu0 %v1168_v53 }
  0x35   :  { %1069 = vmatpush3.bf16.msra.mxu1 %v1170_v55  ;;  %1048 = vmatprep.subr.bf16.mxu0 %v1171_v56 }
  0x36   :  { %1070 = vmatprep.subr.bf16.mxu1 %v1173_v58 }
  0x38   :  { %1049 = vmatpush3.bf16.msra.mxu0 %v1172_v57  ;;  %v987_v57 = vunpack.c.l.bf16 %v986_v51 }
  0x39   :  { %1071 = vmatpush3.bf16.msra.mxu1 %v1174_v59  ;;  %1050 = vmatprep.subr.bf16.mxu0 %v1175_v60 }
  0x3a   :  { %1072 = vmatprep.subr.bf16.mxu1 %v1177_v62 }
  0x3c   :  { %1051 = vmatpush3.bf16.msra.mxu0 %v1176_v61  ;;  %v988_v61 = vunpack.c.h.bf16 %v986_v51 }
  0x3d   :  { %1073 = vmatpush3.bf16.msra.mxu1 %v1178_v63  ;;  %1052 = vmatprep.subr.bf16.mxu0 %v1179_v0 }
  0x3e   :  { %1074 = vmatprep.subr.bf16.mxu1 %v1181_v2 }
  0x40   :  { %1053 = vmatpush3.bf16.msra.mxu0 %v1180_v1 }
  0x41   :  { %1091 = vmatprep.subr.bf16.mxu0 %v1198_v6  ;;  %1075 = vmatpush3.bf16.msra.mxu1 %v1185_v5 }
  0x43   :  { %768 = vmatmul.mubr.bf16.vlgmr.msra.gmra.mxu0 %v1182_v3 }
  0x44   :  { %1107 = vmatprep.mubr.msk.bf16.mxu0 %vm1199_vm0, %v1198_v6  ;;  %1092 = vmatpush3.bf16.msra.mxu0 %v1189_v9 }
  0x45   :  { %809 = vmatmul.mubr.bf16.vlgmr.msra.gmra.mxu1 %v1186_v7  ;;  %1093 = vmatprep.subr.bf16.mxu0 %v1198_v6 }
  0x48   :  { %1094 = vmatpush3.bf16.msra.mxu0 %v1190_v10 }
  0x49   :  { %1095 = vmatprep.subr.bf16.mxu0 %v1198_v6 }
  0x4c   :  { %1096 = vmatpush3.bf16.msra.mxu0 %v1191_v11 }
  0x4d   :  { %1097 = vmatprep.subr.bf16.mxu0 %v1198_v6 }
  0x50   :  { %1098 = vmatpush3.bf16.msra.mxu0 %v1192_v12 }
  0x51   :  { %1099 = vmatprep.subr.bf16.mxu0 %v1198_v6 }
  0x54   :  { %1100 = vmatpush3.bf16.msra.mxu0 %v1193_v13 }
  0x55   :  { %1101 = vmatprep.subr.bf16.mxu0 %v1198_v6 }
  0x58   :  { %1102 = vmatpush3.bf16.msra.mxu0 %v1194_v14 }
  0x59   :  { %1103 = vmatprep.subr.bf16.mxu0 %v1198_v6 }
  0x5c   :  { %1104 = vmatpush3.bf16.msra.mxu0 %v1195_v15 }
  0x5d   :  { %1105 = vmatprep.subr.bf16.mxu0 %v1198_v6 }
  0x60   :  { %1106 = vmatpush3.bf16.msra.mxu0 %v1196_v16 }
  0x63   :  { %1108 = vmatmul.mubr.bf16.vlgmr.msra.gmra.mxu0 %v1197_v17 }
  0xe3   :  { %v1010_v18 = vpop.f32.mrf.mxu0 }
  0xe4   :  { %v1032_v19 = vpop.f32.mrf.mxu1 }
  0xe5   :  { %v1011_v20 = vpop.f32.mrf.mxu0 }
  0xe6   :  { %v1033_v21 = vpop.f32.mrf.mxu1  ;;  %v1012_v31 = vadd.f32 %v1011_v20, %v1010_v18 }
  0xe7   :  { %v1013_v22 = vpop.f32.mrf.mxu0  ;;  %v1034_v32 = vadd.f32 %v1033_v21, %v1032_v19 }
  0xe8   :  { %v1035_v23 = vpop.f32.mrf.mxu1 }
  0xe9   :  { %v1014_v24 = vpop.f32.mrf.mxu0  ;;  %v729_v36 = vadd.f32 %v1034_v32, %v1012_v31 }
  0xea   :  { %v1036_v26 = vpop.f32.mrf.mxu1  ;;  %v1015_v37 = vadd.f32 %v1014_v24, %v1013_v22 }
  0xeb   :  { %v1037_v38 = vadd.f32 %v1036_v26, %v1035_v23 }
  0xed   :  { %v732_v43 = vadd.f32 %v1037_v38, %v1015_v37 }
 0x103   :  { %v1054_v25 = vpop.f32.mrf.mxu0 }
 0x105   :  { %v1055_v27 = vpop.f32.mrf.mxu0  ;;  %v1076_v28 = vpop.f32.mrf.mxu1 }
 0x106   :  { %v1056_v33 = vadd.f32 %v1055_v27, %v1054_v25 }
 0x107   :  { %v1057_v29 = vpop.f32.mrf.mxu0  ;;  %v1077_v30 = vpop.f32.mrf.mxu1 }
 0x108   :  { %v770_v39 = vadd.f32 %v1056_v33, %v729_v36  ;;  %v1078_v40 = vadd.f32 %v1077_v30, %v1076_v28 }
 0x109   :  { %v1058_v34 = vpop.f32.mrf.mxu0  ;;  %v1079_v35 = vpop.f32.mrf.mxu1 }
 0x10a   :  { %v1059_v41 = vadd.f32 %v1058_v34, %v1057_v29  ;;  %v811_v46 = vadd.f32 %v1078_v40, %v770_v39 }
 0x10b   :  { %v1080_v42 = vpop.f32.mrf.mxu1 }
 0x10c   :  { %v773_v44 = vadd.f32 %v1059_v41, %v732_v43  ;;  %v1081_v45 = vadd.f32 %v1080_v42, %v1079_v35 }
 0x10e   :  { %v814_v54 = vadd.f32 %v1081_v45, %v773_v44 }
 0x123   :  { %v851_v47 = vpop.f32.mrf.mxu0 }
 0x124   :  { %v852_v49 = vadd.f32 %v851_v47, %v811_v46 }
 0x125   :  { %v1109_v52 = vpop.f32.mrf.mxu0 }
 0x126   :  { %v865_v53 = vmul.f32 %v979_v48, %v852_v49 }
 0x127   :  { %v854_v55 = vpop.f32.mrf.mxu0 }
 0x128   :  { %v874_v56 = vadd.f32 %v980_v50, %v865_v53  ;;  %v855_v58 = vadd.f32 %v854_v55, %v814_v54 }
 0x129   :  { %v1110_v59 = vpop.f32.mrf.mxu0 }
 0x12a   :  { %v866_v60 = vmul.f32 %v979_v48, %v855_v58  ;;  %v880_v62 = vadd.f32 %v987_v57, %v874_v56 }
 0x12c   :  { %v875_v63 = vadd.f32 %v980_v50, %v866_v60  ;;  %v882_v1 = vmax.f32 %v880_v62, 0.0 }
 0x12e   :  { %v881_v0 = vadd.f32 %v988_v61, %v875_v63 }
 0x130   :  { %v883_v2 = vmax.f32 %v881_v0, 0.0 }
 0x132   :  { %v992_v3 = vpack.c.bf16 %v883_v2, %v882_v1 }
 0x134   :  { %993 = vst [vmem:[%s1490_s5] sm:$0xff] %v992_v3  }

</bundles_post_ra>
